<compile_context>
chip_gen: v5e
topology: v5e:2x2
jax: 0.10.0
libtpu: 0.0.40
codegen_flags: <defaults>
</compile_context>

<pallas_src>
import jax
import jax.numpy as jnp
from jax.experimental import pallas as pl
from jax.experimental.pallas import tpu as pltpu

DIM = 3            # input_size
HIDDEN = 100       # real hidden_size
PAD = 128          # lane-padded hidden size
HEADS = 2
LAYERS = 2
FUSED = HEADS * PAD  # 256: both heads carried in one lane-dense state
OUT = 1            # output_size
EPS = 1e-5         # nn.LayerNorm default eps


def _bf16_split(a):
    """Split an f32 array into bf16 hi + bf16 lo (a ~= hi + lo)."""
    hi = a.astype(jnp.bfloat16)
    lo = (a - hi.astype(jnp.float32)).astype(jnp.bfloat16)
    return hi, lo


def model_kernel(x_ref, win_ref, bin_ref,
                 w0h_ref, w0l_ref, wbdh_ref, wbdl_ref,
                 bh_ref, g_ref, beta_ref,
                 wout_ref, bout_ref, o_ref):
    # Lane masks, computed once and reused across layers.
    lane = jax.lax.broadcasted_iota(jnp.int32, (1, FUSED), 1)
    seg1 = lane >= PAD                       # lanes in head 1's 128-lane segment
    real = (lane & (PAD - 1)) < HIDDEN       # real (non-padded) feature lanes
    inv_n = 1.0 / HIDDEN

    # linear_in as 3 VPU broadcast-FMAs (K=3 is too small for an MXU pass).
    x = x_ref[...]                           # (Bt, DIM)
    w_in = win_ref[...]                      # (DIM, FUSED), head-replicated
    hh = (bin_ref[...]
          + x[:, 0:1] * w_in[0:1, :]
          + x[:, 1:2] * w_in[1:2, :]
          + x[:, 2:3] * w_in[2:3, :])        # (Bt, FUSED); padded lanes exactly 0

    def dot3(a, w_hi, w_lo):
        # bf16x3 emulation of an f32 matmul: hi*hi + hi*lo + lo*hi, f32 acc.
        a_hi, a_lo = _bf16_split(a)
        return (jnp.dot(a_hi, w_hi, preferred_element_type=jnp.float32)
                + jnp.dot(a_hi, w_lo, preferred_element_type=jnp.float32)
                + jnp.dot(a_lo, w_hi, preferred_element_type=jnp.float32))

    def ln_residual(z, resid, l):
        # Per-head LayerNorm over the HIDDEN real lanes of each 128-lane
        # segment.  Padded z lanes are exactly 0 (zero weight columns / bias),
        # so plain 128-lane sums equal the 100-feature sums.
        s0 = jnp.sum(z[:, :PAD], axis=-1, keepdims=True)
        s1 = jnp.sum(z[:, PAD:], axis=-1, keepdims=True)
        mean = jnp.where(seg1, s1, s0) * inv_n           # (Bt, FUSED)
        c = jnp.where(real, z - mean, 0.0)               # centered, masked once
        v0 = jnp.sum(c[:, :PAD] * c[:, :PAD], axis=-1, keepdims=True)
        v1 = jnp.sum(c[:, PAD:] * c[:, PAD:], axis=-1, keepdims=True)
        var = jnp.where(seg1, v1, v0) * inv_n
        norm = c * jax.lax.rsqrt(var + EPS) * g_ref[l] + beta_ref[l]
        return jax.nn.sigmoid(norm + resid)

    # Layer 0: its input is head-replicated, so apply one dense (PAD, FUSED)
    # weight [W_h0_l0 | W_h1_l0] to the first 128 lanes only (half the MACs of
    # the block-diagonal form).
    z = dot3(hh[:, :PAD], w0h_ref[...], w0l_ref[...]) + bh_ref[0]
    hh = ln_residual(z, hh, 0)

    # Layers >= 1: one block-diagonal (FUSED, FUSED) matmul covers both heads.
    # (On v5e this could be further split into two per-head 128x128 matmuls to
    # skip the zero off-diagonal weight tiles; kept fused for v6e/v7x.)
    for l in range(1, LAYERS):
        z = dot3(hh, wbdh_ref[l - 1], wbdl_ref[l - 1]) + bh_ref[l]
        hh = ln_residual(z, hh, l)

    # linear_out (N=1) off the MXU: VPU broadcast-multiply by the wout row,
    # then a cross-lane reduction.  Padded wout lanes are zero, so the nonzero
    # stale padded activations contribute nothing.
    o_ref[...] = (jnp.sum(hh * wout_ref[...], axis=-1, keepdims=True)
                  + bout_ref[...])


def _pick_b_tile(B):
    if B <= 128:
        return B                                  # single block (== full dim)
    if B <= 2048:
        # >= 2 grid steps so the "parallel" batch axis shards across v7x's
        # two TensorCores; round up to a sublane multiple.
        return ((pl.cdiv(B, 2) + 7) // 8) * 8
    return 1024                                   # large B: amortize overhead


@jax.jit
def model_forward(x, packed):
    (win_f, bin_f, w0_hi, w0_lo, wbd_hi, wbd_lo,
     bh_f, g_f, beta_f, wout_row, bout_f) = packed
    B = x.shape[0]
    b_tile = _pick_b_tile(B)
    grid = (pl.cdiv(B, b_tile),)

    def full_spec(a):
        return pl.BlockSpec(a.shape, lambda i, _nd=a.ndim: (0,) * _nd)

    return pl.pallas_call(
        model_kernel,
        out_shape=jax.ShapeDtypeStruct((B, OUT), jnp.float32),
        grid=grid,
        in_specs=[
            pl.BlockSpec((b_tile, DIM), lambda i: (i, 0)),   # x: tiled on batch
            full_spec(win_f), full_spec(bin_f),
            full_spec(w0_hi), full_spec(w0_lo),
            full_spec(wbd_hi), full_spec(wbd_lo),
            full_spec(bh_f), full_spec(g_f), full_spec(beta_f),
            full_spec(wout_row), full_spec(bout_f),
        ],
        out_specs=pl.BlockSpec((b_tile, OUT), lambda i: (i, 0)),
        compiler_params=pltpu.CompilerParams(
            dimension_semantics=("parallel",),
            vmem_limit_bytes=48 * 1024 * 1024),
    )(x, win_f, bin_f, w0_hi, w0_lo, wbd_hi, wbd_lo,
      bh_f, g_f, beta_f, wout_row, bout_f)


def init_params(key):
    """Deterministic parameter init (PyTorch-Linear-style uniform bounds)."""
    ks = jax.random.split(key, 8)

    def lin(k, fan_in, fan_out):
        bound = 1.0 / jnp.sqrt(fan_in)
        kw, kb = jax.random.split(k)
        w = jax.random.uniform(kw, (fan_in, fan_out), jnp.float32, -bound, bound)
        b = jax.random.uniform(kb, (1, fan_out), jnp.float32, -bound, bound)
        return w, b

    win, bin_ = lin(ks[0], DIM, HIDDEN)

    wh_list, bh_list = [], []
    hkeys = jax.random.split(ks[1], HEADS * LAYERS)
    for i in range(HEADS * LAYERS):
        w, b = lin(hkeys[i], HIDDEN, HIDDEN)
        wh_list.append(w)
        bh_list.append(b[0])
    wh = jnp.stack(wh_list)                      # (HEADS*LAYERS, HIDDEN, HIDDEN)
    bh = jnp.stack(bh_list)                      # (HEADS*LAYERS, HIDDEN)
    g = jnp.ones((HEADS * LAYERS, HIDDEN), jnp.float32)      # LayerNorm gamma
    beta = jnp.zeros((HEADS * LAYERS, HIDDEN), jnp.float32)  # LayerNorm beta

    wout, bout = lin(ks[2], HIDDEN * HEADS, OUT)
    return (win, bin_, wh, bh, g, beta, wout, bout)


def pack_params(params):
    """Pad to 128 lanes, fuse heads, and pre-split layer weights into bf16 hi/lo."""
    (win, bin_, wh, bh, g, beta, wout, bout) = params

    def pad_lane(a):
        pad = [(0, 0)] * (a.ndim - 1) + [(0, PAD - a.shape[-1])]
        return jnp.pad(a, pad)

    # linear_in replicated for both heads: (DIM, FUSED)
    win_f = jnp.concatenate([pad_lane(win)] * HEADS, axis=-1)
    bin_f = jnp.concatenate([pad_lane(bin_)] * HEADS, axis=-1)   # (1, FUSED)

    # Layer 0: dense (PAD, FUSED) weight acting on the head-replicated input.
    w0 = jnp.zeros((PAD, FUSED), jnp.float32)
    for h in range(HEADS):
        w0 = w0.at[:HIDDEN, h * PAD:h * PAD + HIDDEN].set(wh[h * LAYERS + 0])

    # Layers >= 1: block-diagonal (FUSED, FUSED) weight per layer.
    w_bd = jnp.zeros((LAYERS - 1, FUSED, FUSED), jnp.float32)
    for h in range(HEADS):
        for l in range(1, LAYERS):
            r = slice(h * PAD, h * PAD + HIDDEN)
            w_bd = w_bd.at[l - 1, r, r].set(wh[h * LAYERS + l])

    bh_f = jnp.zeros((LAYERS, 1, FUSED), jnp.float32)
    g_f = jnp.zeros((LAYERS, 1, FUSED), jnp.float32)
    beta_f = jnp.zeros((LAYERS, 1, FUSED), jnp.float32)
    for h in range(HEADS):
        for l in range(LAYERS):
            idx = h * LAYERS + l
            c = slice(h * PAD, h * PAD + HIDDEN)
            bh_f = bh_f.at[l, 0, c].set(bh[idx])
            g_f = g_f.at[l, 0, c].set(g[idx])
            beta_f = beta_f.at[l, 0, c].set(beta[idx])

    # linear_out as a padded row vector for the VPU multiply + lane reduction.
    wout_row = jnp.zeros((1, FUSED), jnp.float32)
    for h in range(HEADS):
        wout_row = wout_row.at[0, h * PAD:h * PAD + HIDDEN].set(
            wout[h * HIDDEN:(h + 1) * HIDDEN, 0])
    bout_f = bout                                                # (1, OUT)

    w0_hi, w0_lo = _bf16_split(w0)
    wbd_hi, wbd_lo = _bf16_split(w_bd)

    return (win_f, bin_f, w0_hi, w0_lo, wbd_hi, wbd_lo,
            bh_f, g_f, beta_f, wout_row, bout_f)


def reference_forward(x, params):
    """Plain-JAX reference (matches the PyTorch module, f32-accurate matmuls)."""
    (win, bin_, wh, bh, g, beta, wout, bout) = params
    pp = jax.lax.Precision.HIGHEST
    hidden = jnp.dot(x, win, precision=pp) + bin_
    outs = []
    for h in range(HEADS):
        hh = hidden
        for l in range(LAYERS):
            idx = h * LAYERS + l
            z = jnp.dot(hh, wh[idx], precision=pp) + bh[idx]
            mean = jnp.mean(z, axis=-1, keepdims=True)
            var = jnp.mean((z - mean) ** 2, axis=-1, keepdims=True)
            norm = (z - mean) / jnp.sqrt(var + EPS) * g[idx] + beta[idx]
            hh = jax.nn.sigmoid(norm + hh)
        outs.append(hh)
    concat = jnp.concatenate(outs, axis=-1)
    return jnp.dot(concat, wout, precision=pp) + bout


if __name__ == "__main__":
    key = jax.random.PRNGKey(0)
    kx, kp = jax.random.split(key)
    B = 8
    x = jax.random.normal(kx, (B, DIM), jnp.float32)
    params = init_params(kp)
    packed = pack_params(params)

    out = model_forward(x, packed)
    out = jax.block_until_ready(out)

    ref = reference_forward(x, params)
    assert out.shape == (B, OUT), out.shape
    assert jnp.allclose(out, ref, atol=1e-4, rtol=1e-4), (out, ref)
    print("KERNEL_OK")
</pallas_src>

<mosaic_0001>
module attributes {stable_mosaic.version = 11 : i64} {
  func.func @model_kernel(%arg0: i32, %arg1: memref<8x3xf32, #tpu.memory_space<vmem>>, %arg2: memref<3x256xf32, #tpu.memory_space<vmem>>, %arg3: memref<1x256xf32, #tpu.memory_space<vmem>>, %arg4: memref<128x256xbf16, #tpu.memory_space<vmem>>, %arg5: memref<128x256xbf16, #tpu.memory_space<vmem>>, %arg6: memref<1x256x256xbf16, #tpu.memory_space<vmem>>, %arg7: memref<1x256x256xbf16, #tpu.memory_space<vmem>>, %arg8: memref<2x1x256xf32, #tpu.memory_space<vmem>>, %arg9: memref<2x1x256xf32, #tpu.memory_space<vmem>>, %arg10: memref<2x1x256xf32, #tpu.memory_space<vmem>>, %arg11: memref<1x256xf32, #tpu.memory_space<vmem>>, %arg12: memref<1x1xf32, #tpu.memory_space<vmem>>, %arg13: memref<8x1xf32, #tpu.memory_space<vmem>>) attributes {dimension_semantics = [#tpu.dimension_semantics<parallel>], iteration_bounds = array<i64: 1>, scalar_prefetch = 0 : i64, scratch_operands = 0 : i64, tpu.core_type = #tpu.core_type<tc>, window_params = [{transform_indices = @transform_0, window_bounds = array<i64: 8, 3>}, {pipeline_mode = #tpu.pipeline_mode<synchronous>, transform_indices = @transform_1, window_bounds = array<i64: 3, 256>}, {pipeline_mode = #tpu.pipeline_mode<synchronous>, transform_indices = @transform_2, window_bounds = array<i64: 1, 256>}, {pipeline_mode = #tpu.pipeline_mode<synchronous>, transform_indices = @transform_3, window_bounds = array<i64: 128, 256>}, {pipeline_mode = #tpu.pipeline_mode<synchronous>, transform_indices = @transform_4, window_bounds = array<i64: 128, 256>}, {pipeline_mode = #tpu.pipeline_mode<synchronous>, transform_indices = @transform_5, window_bounds = array<i64: 1, 256, 256>}, {pipeline_mode = #tpu.pipeline_mode<synchronous>, transform_indices = @transform_6, window_bounds = array<i64: 1, 256, 256>}, {pipeline_mode = #tpu.pipeline_mode<synchronous>, transform_indices = @transform_7, window_bounds = array<i64: 2, 1, 256>}, {pipeline_mode = #tpu.pipeline_mode<synchronous>, transform_indices = @transform_8, window_bounds = array<i64: 2, 1, 256>}, {pipeline_mode = #tpu.pipeline_mode<synchronous>, transform_indices = @transform_9, window_bounds = array<i64: 2, 1, 256>}, {pipeline_mode = #tpu.pipeline_mode<synchronous>, transform_indices = @transform_10, window_bounds = array<i64: 1, 256>}, {pipeline_mode = #tpu.pipeline_mode<synchronous>, transform_indices = @transform_11, window_bounds = array<i64: 1, 1>}, {transform_indices = @transform_12, window_bounds = array<i64: 8, 1>}]} {
    %0 = tpu.iota {dimensions = array<i32: 1>} : vector<1x256xi32>
    %c128_i32 = arith.constant 128 : i32
    %1 = vector.broadcast %c128_i32 : i32 to vector<1x256xi32>
    %2 = arith.cmpi sge, %0, %1 : vector<1x256xi32>
    %c127_i32 = arith.constant 127 : i32
    %3 = vector.broadcast %c127_i32 : i32 to vector<1x256xi32>
    %4 = arith.andi %0, %3 : vector<1x256xi32>
    %c100_i32 = arith.constant 100 : i32
    %5 = vector.broadcast %c100_i32 : i32 to vector<1x256xi32>
    %6 = arith.cmpi slt, %4, %5 : vector<1x256xi32>
    %c0 = arith.constant 0 : index
    %c0_0 = arith.constant 0 : index
    %7 = vector.load %arg1[%c0, %c0_0] : memref<8x3xf32, #tpu.memory_space<vmem>>, vector<8x3xf32>
    %c0_1 = arith.constant 0 : index
    %c0_2 = arith.constant 0 : index
    %8 = vector.load %arg2[%c0_1, %c0_2] : memref<3x256xf32, #tpu.memory_space<vmem>>, vector<3x256xf32>
    %c0_3 = arith.constant 0 : index
    %c0_4 = arith.constant 0 : index
    %9 = vector.load %arg3[%c0_3, %c0_4] : memref<1x256xf32, #tpu.memory_space<vmem>>, vector<1x256xf32>
    %10 = vector.extract_strided_slice %7 {offsets = [0, 0], sizes = [8, 1], strides = [1, 1]} : vector<8x3xf32> to vector<8x1xf32>
    %11 = vector.extract_strided_slice %8 {offsets = [0, 0], sizes = [1, 256], strides = [1, 1]} : vector<3x256xf32> to vector<1x256xf32>
    %12 = vector.broadcast %10 : vector<8x1xf32> to vector<8x256xf32>
    %13 = vector.broadcast %11 : vector<1x256xf32> to vector<8x256xf32>
    %14 = arith.mulf %12, %13 : vector<8x256xf32>
    %15 = vector.broadcast %9 : vector<1x256xf32> to vector<8x256xf32>
    %16 = arith.addf %15, %14 : vector<8x256xf32>
    %17 = vector.extract_strided_slice %7 {offsets = [0, 1], sizes = [8, 1], strides = [1, 1]} : vector<8x3xf32> to vector<8x1xf32>
    %18 = vector.extract_strided_slice %8 {offsets = [1, 0], sizes = [1, 256], strides = [1, 1]} : vector<3x256xf32> to vector<1x256xf32>
    %19 = vector.broadcast %17 : vector<8x1xf32> to vector<8x256xf32>
    %20 = vector.broadcast %18 : vector<1x256xf32> to vector<8x256xf32>
    %21 = arith.mulf %19, %20 : vector<8x256xf32>
    %22 = arith.addf %16, %21 : vector<8x256xf32>
    %23 = vector.extract_strided_slice %7 {offsets = [0, 2], sizes = [8, 1], strides = [1, 1]} : vector<8x3xf32> to vector<8x1xf32>
    %24 = vector.extract_strided_slice %8 {offsets = [2, 0], sizes = [1, 256], strides = [1, 1]} : vector<3x256xf32> to vector<1x256xf32>
    %25 = vector.broadcast %23 : vector<8x1xf32> to vector<8x256xf32>
    %26 = vector.broadcast %24 : vector<1x256xf32> to vector<8x256xf32>
    %27 = arith.mulf %25, %26 : vector<8x256xf32>
    %28 = arith.addf %22, %27 : vector<8x256xf32>
    %29 = vector.extract_strided_slice %28 {offsets = [0, 0], sizes = [8, 128], strides = [1, 1]} : vector<8x256xf32> to vector<8x128xf32>
    %c0_5 = arith.constant 0 : index
    %c0_6 = arith.constant 0 : index
    %30 = vector.load %arg4[%c0_5, %c0_6] : memref<128x256xbf16, #tpu.memory_space<vmem>>, vector<128x256xbf16>
    %c0_7 = arith.constant 0 : index
    %c0_8 = arith.constant 0 : index
    %31 = vector.load %arg5[%c0_7, %c0_8] : memref<128x256xbf16, #tpu.memory_space<vmem>>, vector<128x256xbf16>
    %32 = arith.truncf %29 : vector<8x128xf32> to vector<8x128xbf16>
    %33 = arith.extf %32 : vector<8x128xbf16> to vector<8x128xf32>
    %34 = arith.subf %29, %33 : vector<8x128xf32>
    %35 = arith.truncf %34 : vector<8x128xf32> to vector<8x128xbf16>
    %cst = arith.constant dense<0.000000e+00> : vector<8x256xf32>
    %36 = tpu.matmul %32, %30, %cst {dimension_numbers = #tpu.dot_dimension_numbers<[1], [0], [0], [1], [0, 0, 1, 1], [], []>} : vector<8x128xbf16>, vector<128x256xbf16>, vector<8x256xf32> -> vector<8x256xf32>
    %cst_9 = arith.constant dense<0.000000e+00> : vector<8x256xf32>
    %37 = tpu.matmul %32, %31, %cst_9 {dimension_numbers = #tpu.dot_dimension_numbers<[1], [0], [0], [1], [0, 0, 1, 1], [], []>} : vector<8x128xbf16>, vector<128x256xbf16>, vector<8x256xf32> -> vector<8x256xf32>
    %38 = arith.addf %36, %37 : vector<8x256xf32>
    %cst_10 = arith.constant dense<0.000000e+00> : vector<8x256xf32>
    %39 = tpu.matmul %35, %30, %cst_10 {dimension_numbers = #tpu.dot_dimension_numbers<[1], [0], [0], [1], [0, 0, 1, 1], [], []>} : vector<8x128xbf16>, vector<128x256xbf16>, vector<8x256xf32> -> vector<8x256xf32>
    %40 = arith.addf %38, %39 : vector<8x256xf32>
    %c0_11 = arith.constant 0 : index
    %c0_12 = arith.constant 0 : index
    %c0_13 = arith.constant 0 : index
    %41 = vector.load %arg8[%c0_11, %c0_12, %c0_13] : memref<2x1x256xf32, #tpu.memory_space<vmem>>, vector<1x1x256xf32>
    %42 = vector.shape_cast %41 : vector<1x1x256xf32> to vector<1x256xf32>
    %43 = vector.broadcast %42 : vector<1x256xf32> to vector<8x256xf32>
    %44 = arith.addf %40, %43 : vector<8x256xf32>
    %45 = vector.extract_strided_slice %44 {offsets = [0, 0], sizes = [8, 128], strides = [1, 1]} : vector<8x256xf32> to vector<8x128xf32>
    %cst_14 = arith.constant dense<0.000000e+00> : vector<8xf32>
    %46 = vector.multi_reduction <add>, %45, %cst_14 [1] : vector<8x128xf32> to vector<8xf32>
    %47 = vector.shape_cast %46 : vector<8xf32> to vector<8x1xf32>
    %48 = vector.extract_strided_slice %44 {offsets = [0, 128], sizes = [8, 128], strides = [1, 1]} : vector<8x256xf32> to vector<8x128xf32>
    %cst_15 = arith.constant dense<0.000000e+00> : vector<8xf32>
    %49 = vector.multi_reduction <add>, %48, %cst_15 [1] : vector<8x128xf32> to vector<8xf32>
    %50 = vector.shape_cast %49 : vector<8xf32> to vector<8x1xf32>
    %51 = vector.shape_cast %2 : vector<1x256xi1> to vector<1x256xi1>
    %52 = vector.broadcast %51 : vector<1x256xi1> to vector<8x256xi1>
    %53 = vector.shape_cast %50 : vector<8x1xf32> to vector<8x1xf32>
    %54 = vector.broadcast %53 : vector<8x1xf32> to vector<8x256xf32>
    %55 = vector.shape_cast %47 : vector<8x1xf32> to vector<8x1xf32>
    %56 = vector.broadcast %55 : vector<8x1xf32> to vector<8x256xf32>
    %57 = arith.select %52, %54, %56 : vector<8x256xi1>, vector<8x256xf32>
    %cst_16 = arith.constant 0.00999999977 : f32
    %58 = vector.broadcast %cst_16 : f32 to vector<8x256xf32>
    %59 = arith.mulf %57, %58 : vector<8x256xf32>
    %60 = arith.subf %44, %59 : vector<8x256xf32>
    %cst_17 = arith.constant 0.000000e+00 : f32
    %61 = vector.shape_cast %6 : vector<1x256xi1> to vector<1x256xi1>
    %62 = vector.broadcast %61 : vector<1x256xi1> to vector<8x256xi1>
    %63 = vector.broadcast %cst_17 : f32 to vector<8x256xf32>
    %64 = arith.select %62, %60, %63 : vector<8x256xi1>, vector<8x256xf32>
    %65 = vector.extract_strided_slice %64 {offsets = [0, 0], sizes = [8, 128], strides = [1, 1]} : vector<8x256xf32> to vector<8x128xf32>
    %66 = vector.extract_strided_slice %64 {offsets = [0, 0], sizes = [8, 128], strides = [1, 1]} : vector<8x256xf32> to vector<8x128xf32>
    %67 = arith.mulf %65, %66 : vector<8x128xf32>
    %cst_18 = arith.constant dense<0.000000e+00> : vector<8xf32>
    %68 = vector.multi_reduction <add>, %67, %cst_18 [1] : vector<8x128xf32> to vector<8xf32>
    %69 = vector.shape_cast %68 : vector<8xf32> to vector<8x1xf32>
    %70 = vector.extract_strided_slice %64 {offsets = [0, 128], sizes = [8, 128], strides = [1, 1]} : vector<8x256xf32> to vector<8x128xf32>
    %71 = vector.extract_strided_slice %64 {offsets = [0, 128], sizes = [8, 128], strides = [1, 1]} : vector<8x256xf32> to vector<8x128xf32>
    %72 = arith.mulf %70, %71 : vector<8x128xf32>
    %cst_19 = arith.constant dense<0.000000e+00> : vector<8xf32>
    %73 = vector.multi_reduction <add>, %72, %cst_19 [1] : vector<8x128xf32> to vector<8xf32>
    %74 = vector.shape_cast %73 : vector<8xf32> to vector<8x1xf32>
    %75 = vector.shape_cast %2 : vector<1x256xi1> to vector<1x256xi1>
    %76 = vector.broadcast %75 : vector<1x256xi1> to vector<8x256xi1>
    %77 = vector.shape_cast %74 : vector<8x1xf32> to vector<8x1xf32>
    %78 = vector.broadcast %77 : vector<8x1xf32> to vector<8x256xf32>
    %79 = vector.shape_cast %69 : vector<8x1xf32> to vector<8x1xf32>
    %80 = vector.broadcast %79 : vector<8x1xf32> to vector<8x256xf32>
    %81 = arith.select %76, %78, %80 : vector<8x256xi1>, vector<8x256xf32>
    %cst_20 = arith.constant 0.00999999977 : f32
    %82 = vector.broadcast %cst_20 : f32 to vector<8x256xf32>
    %83 = arith.mulf %81, %82 : vector<8x256xf32>
    %cst_21 = arith.constant 9.99999974E-6 : f32
    %84 = vector.broadcast %cst_21 : f32 to vector<8x256xf32>
    %85 = arith.addf %83, %84 : vector<8x256xf32>
    %86 = math.rsqrt %85 : vector<8x256xf32>
    %87 = arith.mulf %64, %86 : vector<8x256xf32>
    %c0_22 = arith.constant 0 : index
    %c0_23 = arith.constant 0 : index
    %c0_24 = arith.constant 0 : index
    %88 = vector.load %arg9[%c0_22, %c0_23, %c0_24] : memref<2x1x256xf32, #tpu.memory_space<vmem>>, vector<1x1x256xf32>
    %89 = vector.shape_cast %88 : vector<1x1x256xf32> to vector<1x256xf32>
    %90 = vector.broadcast %89 : vector<1x256xf32> to vector<8x256xf32>
    %91 = arith.mulf %87, %90 : vector<8x256xf32>
    %c0_25 = arith.constant 0 : index
    %c0_26 = arith.constant 0 : index
    %c0_27 = arith.constant 0 : index
    %92 = vector.load %arg10[%c0_25, %c0_26, %c0_27] : memref<2x1x256xf32, #tpu.memory_space<vmem>>, vector<1x1x256xf32>
    %93 = vector.shape_cast %92 : vector<1x1x256xf32> to vector<1x256xf32>
    %94 = vector.broadcast %93 : vector<1x256xf32> to vector<8x256xf32>
    %95 = arith.addf %91, %94 : vector<8x256xf32>
    %96 = arith.addf %95, %28 : vector<8x256xf32>
    %97 = arith.negf %96 : vector<8x256xf32>
    %98 = math.exp %97 : vector<8x256xf32>
    %cst_28 = arith.constant 1.000000e+00 : f32
    %99 = vector.broadcast %cst_28 : f32 to vector<8x256xf32>
    %100 = arith.addf %99, %98 : vector<8x256xf32>
    %101 = arith.divf %99, %100 : vector<8x256xf32>
    %c0_29 = arith.constant 0 : index
    %c0_30 = arith.constant 0 : index
    %c0_31 = arith.constant 0 : index
    %102 = vector.load %arg6[%c0_29, %c0_30, %c0_31] : memref<1x256x256xbf16, #tpu.memory_space<vmem>>, vector<1x256x256xbf16>
    %103 = vector.shape_cast %102 : vector<1x256x256xbf16> to vector<256x256xbf16>
    %c0_32 = arith.constant 0 : index
    %c0_33 = arith.constant 0 : index
    %c0_34 = arith.constant 0 : index
    %104 = vector.load %arg7[%c0_32, %c0_33, %c0_34] : memref<1x256x256xbf16, #tpu.memory_space<vmem>>, vector<1x256x256xbf16>
    %105 = vector.shape_cast %104 : vector<1x256x256xbf16> to vector<256x256xbf16>
    %106 = arith.truncf %101 : vector<8x256xf32> to vector<8x256xbf16>
    %107 = arith.extf %106 : vector<8x256xbf16> to vector<8x256xf32>
    %108 = arith.subf %101, %107 : vector<8x256xf32>
    %109 = arith.truncf %108 : vector<8x256xf32> to vector<8x256xbf16>
    %cst_35 = arith.constant dense<0.000000e+00> : vector<8x256xf32>
    %110 = tpu.matmul %106, %103, %cst_35 {dimension_numbers = #tpu.dot_dimension_numbers<[1], [0], [0], [1], [0, 0, 1, 1], [], []>} : vector<8x256xbf16>, vector<256x256xbf16>, vector<8x256xf32> -> vector<8x256xf32>
    %cst_36 = arith.constant dense<0.000000e+00> : vector<8x256xf32>
    %111 = tpu.matmul %106, %105, %cst_36 {dimension_numbers = #tpu.dot_dimension_numbers<[1], [0], [0], [1], [0, 0, 1, 1], [], []>} : vector<8x256xbf16>, vector<256x256xbf16>, vector<8x256xf32> -> vector<8x256xf32>
    %112 = arith.addf %110, %111 : vector<8x256xf32>
    %cst_37 = arith.constant dense<0.000000e+00> : vector<8x256xf32>
    %113 = tpu.matmul %109, %103, %cst_37 {dimension_numbers = #tpu.dot_dimension_numbers<[1], [0], [0], [1], [0, 0, 1, 1], [], []>} : vector<8x256xbf16>, vector<256x256xbf16>, vector<8x256xf32> -> vector<8x256xf32>
    %114 = arith.addf %112, %113 : vector<8x256xf32>
    %c1 = arith.constant 1 : index
    %c0_38 = arith.constant 0 : index
    %c0_39 = arith.constant 0 : index
    %115 = vector.load %arg8[%c1, %c0_38, %c0_39] : memref<2x1x256xf32, #tpu.memory_space<vmem>>, vector<1x1x256xf32>
    %116 = vector.shape_cast %115 : vector<1x1x256xf32> to vector<1x256xf32>
    %117 = vector.broadcast %116 : vector<1x256xf32> to vector<8x256xf32>
    %118 = arith.addf %114, %117 : vector<8x256xf32>
    %119 = vector.extract_strided_slice %118 {offsets = [0, 0], sizes = [8, 128], strides = [1, 1]} : vector<8x256xf32> to vector<8x128xf32>
    %cst_40 = arith.constant dense<0.000000e+00> : vector<8xf32>
    %120 = vector.multi_reduction <add>, %119, %cst_40 [1] : vector<8x128xf32> to vector<8xf32>
    %121 = vector.shape_cast %120 : vector<8xf32> to vector<8x1xf32>
    %122 = vector.extract_strided_slice %118 {offsets = [0, 128], sizes = [8, 128], strides = [1, 1]} : vector<8x256xf32> to vector<8x128xf32>
    %cst_41 = arith.constant dense<0.000000e+00> : vector<8xf32>
    %123 = vector.multi_reduction <add>, %122, %cst_41 [1] : vector<8x128xf32> to vector<8xf32>
    %124 = vector.shape_cast %123 : vector<8xf32> to vector<8x1xf32>
    %125 = vector.shape_cast %2 : vector<1x256xi1> to vector<1x256xi1>
    %126 = vector.broadcast %125 : vector<1x256xi1> to vector<8x256xi1>
    %127 = vector.shape_cast %124 : vector<8x1xf32> to vector<8x1xf32>
    %128 = vector.broadcast %127 : vector<8x1xf32> to vector<8x256xf32>
    %129 = vector.shape_cast %121 : vector<8x1xf32> to vector<8x1xf32>
    %130 = vector.broadcast %129 : vector<8x1xf32> to vector<8x256xf32>
    %131 = arith.select %126, %128, %130 : vector<8x256xi1>, vector<8x256xf32>
    %cst_42 = arith.constant 0.00999999977 : f32
    %132 = vector.broadcast %cst_42 : f32 to vector<8x256xf32>
    %133 = arith.mulf %131, %132 : vector<8x256xf32>
    %134 = arith.subf %118, %133 : vector<8x256xf32>
    %cst_43 = arith.constant 0.000000e+00 : f32
    %135 = vector.shape_cast %6 : vector<1x256xi1> to vector<1x256xi1>
    %136 = vector.broadcast %135 : vector<1x256xi1> to vector<8x256xi1>
    %137 = vector.broadcast %cst_43 : f32 to vector<8x256xf32>
    %138 = arith.select %136, %134, %137 : vector<8x256xi1>, vector<8x256xf32>
    %139 = vector.extract_strided_slice %138 {offsets = [0, 0], sizes = [8, 128], strides = [1, 1]} : vector<8x256xf32> to vector<8x128xf32>
    %140 = vector.extract_strided_slice %138 {offsets = [0, 0], sizes = [8, 128], strides = [1, 1]} : vector<8x256xf32> to vector<8x128xf32>
    %141 = arith.mulf %139, %140 : vector<8x128xf32>
    %cst_44 = arith.constant dense<0.000000e+00> : vector<8xf32>
    %142 = vector.multi_reduction <add>, %141, %cst_44 [1] : vector<8x128xf32> to vector<8xf32>
    %143 = vector.shape_cast %142 : vector<8xf32> to vector<8x1xf32>
    %144 = vector.extract_strided_slice %138 {offsets = [0, 128], sizes = [8, 128], strides = [1, 1]} : vector<8x256xf32> to vector<8x128xf32>
    %145 = vector.extract_strided_slice %138 {offsets = [0, 128], sizes = [8, 128], strides = [1, 1]} : vector<8x256xf32> to vector<8x128xf32>
    %146 = arith.mulf %144, %145 : vector<8x128xf32>
    %cst_45 = arith.constant dense<0.000000e+00> : vector<8xf32>
    %147 = vector.multi_reduction <add>, %146, %cst_45 [1] : vector<8x128xf32> to vector<8xf32>
    %148 = vector.shape_cast %147 : vector<8xf32> to vector<8x1xf32>
    %149 = vector.shape_cast %2 : vector<1x256xi1> to vector<1x256xi1>
    %150 = vector.broadcast %149 : vector<1x256xi1> to vector<8x256xi1>
    %151 = vector.shape_cast %148 : vector<8x1xf32> to vector<8x1xf32>
    %152 = vector.broadcast %151 : vector<8x1xf32> to vector<8x256xf32>
    %153 = vector.shape_cast %143 : vector<8x1xf32> to vector<8x1xf32>
    %154 = vector.broadcast %153 : vector<8x1xf32> to vector<8x256xf32>
    %155 = arith.select %150, %152, %154 : vector<8x256xi1>, vector<8x256xf32>
    %cst_46 = arith.constant 0.00999999977 : f32
    %156 = vector.broadcast %cst_46 : f32 to vector<8x256xf32>
    %157 = arith.mulf %155, %156 : vector<8x256xf32>
    %cst_47 = arith.constant 9.99999974E-6 : f32
    %158 = vector.broadcast %cst_47 : f32 to vector<8x256xf32>
    %159 = arith.addf %157, %158 : vector<8x256xf32>
    %160 = math.rsqrt %159 : vector<8x256xf32>
    %161 = arith.mulf %138, %160 : vector<8x256xf32>
    %c1_48 = arith.constant 1 : index
    %c0_49 = arith.constant 0 : index
    %c0_50 = arith.constant 0 : index
    %162 = vector.load %arg9[%c1_48, %c0_49, %c0_50] : memref<2x1x256xf32, #tpu.memory_space<vmem>>, vector<1x1x256xf32>
    %163 = vector.shape_cast %162 : vector<1x1x256xf32> to vector<1x256xf32>
    %164 = vector.broadcast %163 : vector<1x256xf32> to vector<8x256xf32>
    %165 = arith.mulf %161, %164 : vector<8x256xf32>
    %c1_51 = arith.constant 1 : index
    %c0_52 = arith.constant 0 : index
    %c0_53 = arith.constant 0 : index
    %166 = vector.load %arg10[%c1_51, %c0_52, %c0_53] : memref<2x1x256xf32, #tpu.memory_space<vmem>>, vector<1x1x256xf32>
    %167 = vector.shape_cast %166 : vector<1x1x256xf32> to vector<1x256xf32>
    %168 = vector.broadcast %167 : vector<1x256xf32> to vector<8x256xf32>
    %169 = arith.addf %165, %168 : vector<8x256xf32>
    %170 = arith.addf %169, %101 : vector<8x256xf32>
    %171 = arith.negf %170 : vector<8x256xf32>
    %172 = math.exp %171 : vector<8x256xf32>
    %cst_54 = arith.constant 1.000000e+00 : f32
    %173 = vector.broadcast %cst_54 : f32 to vector<8x256xf32>
    %174 = arith.addf %173, %172 : vector<8x256xf32>
    %175 = arith.divf %173, %174 : vector<8x256xf32>
    %c0_55 = arith.constant 0 : index
    %c0_56 = arith.constant 0 : index
    %176 = vector.load %arg11[%c0_55, %c0_56] : memref<1x256xf32, #tpu.memory_space<vmem>>, vector<1x256xf32>
    %177 = vector.broadcast %176 : vector<1x256xf32> to vector<8x256xf32>
    %178 = arith.mulf %175, %177 : vector<8x256xf32>
    %cst_57 = arith.constant dense<0.000000e+00> : vector<8xf32>
    %179 = vector.multi_reduction <add>, %178, %cst_57 [1] : vector<8x256xf32> to vector<8xf32>
    %180 = vector.shape_cast %179 : vector<8xf32> to vector<8x1xf32>
    %c0_58 = arith.constant 0 : index
    %c0_59 = arith.constant 0 : index
    %181 = vector.load %arg12[%c0_58, %c0_59] : memref<1x1xf32, #tpu.memory_space<vmem>>, vector<1x1xf32>
    %182 = vector.broadcast %181 : vector<1x1xf32> to vector<8x1xf32>
    %183 = arith.addf %180, %182 : vector<8x1xf32>
    %c0_60 = arith.constant 0 : index
    %c0_61 = arith.constant 0 : index
    %184 = vector.load %arg13[%c0_60, %c0_61] : memref<8x1xf32, #tpu.memory_space<vmem>>, vector<8x1xf32>
    tpu.vector_store %arg13[%c0_60, %c0_61], %183 {strides = array<i32>} : memref<8x1xf32, #tpu.memory_space<vmem>>, vector<8x1xf32>,
    return
  }
  func.func @transform_0(%arg0: i32) -> (i32, i32) {
    %c0_i32 = arith.constant 0 : i32
    %c0_i32_0 = arith.constant 0 : i32
    return %arg0, %c0_i32 : i32, i32
  }
  func.func @transform_1(%arg0: i32) -> (i32, i32) {
    %c0_i32 = arith.constant 0 : i32
    %c0_i32_0 = arith.constant 0 : i32
    %c0_i32_1 = arith.constant 0 : i32
    return %c0_i32, %c0_i32_0 : i32, i32
  }
  func.func @transform_2(%arg0: i32) -> (i32, i32) {
    %c0_i32 = arith.constant 0 : i32
    %c0_i32_0 = arith.constant 0 : i32
    %c0_i32_1 = arith.constant 0 : i32
    return %c0_i32, %c0_i32_0 : i32, i32
  }
  func.func @transform_3(%arg0: i32) -> (i32, i32) {
    %c0_i32 = arith.constant 0 : i32
    %c0_i32_0 = arith.constant 0 : i32
    %c0_i32_1 = arith.constant 0 : i32
    return %c0_i32, %c0_i32_0 : i32, i32
  }
  func.func @transform_4(%arg0: i32) -> (i32, i32) {
    %c0_i32 = arith.constant 0 : i32
    %c0_i32_0 = arith.constant 0 : i32
    %c0_i32_1 = arith.constant 0 : i32
    return %c0_i32, %c0_i32_0 : i32, i32
  }
  func.func @transform_5(%arg0: i32) -> (i32, i32, i32) {
    %c0_i32 = arith.constant 0 : i32
    %c0_i32_0 = arith.constant 0 : i32
    %c0_i32_1 = arith.constant 0 : i32
    %c0_i32_2 = arith.constant 0 : i32
    return %c0_i32, %c0_i32_0, %c0_i32_1 : i32, i32, i32
  }
  func.func @transform_6(%arg0: i32) -> (i32, i32, i32) {
    %c0_i32 = arith.constant 0 : i32
    %c0_i32_0 = arith.constant 0 : i32
    %c0_i32_1 = arith.constant 0 : i32
    %c0_i32_2 = arith.constant 0 : i32
    return %c0_i32, %c0_i32_0, %c0_i32_1 : i32, i32, i32
  }
  func.func @transform_7(%arg0: i32) -> (i32, i32, i32) {
    %c0_i32 = arith.constant 0 : i32
    %c0_i32_0 = arith.constant 0 : i32
    %c0_i32_1 = arith.constant 0 : i32
    %c0_i32_2 = arith.constant 0 : i32
    return %c0_i32, %c0_i32_0, %c0_i32_1 : i32, i32, i32
  }
  func.func @transform_8(%arg0: i32) -> (i32, i32, i32) {
    %c0_i32 = arith.constant 0 : i32
    %c0_i32_0 = arith.constant 0 : i32
    %c0_i32_1 = arith.constant 0 : i32
    %c0_i32_2 = arith.constant 0 : i32
    return %c0_i32, %c0_i32_0, %c0_i32_1 : i32, i32, i32
  }
  func.func @transform_9(%arg0: i32) -> (i32, i32, i32) {
    %c0_i32 = arith.constant 0 : i32
    %c0_i32_0 = arith.constant 0 : i32
    %c0_i32_1 = arith.constant 0 : i32
    %c0_i32_2 = arith.constant 0 : i32
    return %c0_i32, %c0_i32_0, %c0_i32_1 : i32, i32, i32
  }
  func.func @transform_10(%arg0: i32) -> (i32, i32) {
    %c0_i32 = arith.constant 0 : i32
    %c0_i32_0 = arith.constant 0 : i32
    %c0_i32_1 = arith.constant 0 : i32
    return %c0_i32, %c0_i32_0 : i32, i32
  }
  func.func @transform_11(%arg0: i32) -> (i32, i32) {
    %c0_i32 = arith.constant 0 : i32
    %c0_i32_0 = arith.constant 0 : i32
    %c0_i32_1 = arith.constant 0 : i32
    return %c0_i32, %c0_i32_0 : i32, i32
  }
  func.func @transform_12(%arg0: i32) -> (i32, i32) {
    %c0_i32 = arith.constant 0 : i32
    %c0_i32_0 = arith.constant 0 : i32
    return %arg0, %c0_i32 : i32, i32
  }
}

</mosaic_0001>

<bundles_post_ra>
// kernel: model_forward.1
= control target key start
LH: loop header
LB: loop body
LE: loop exit
PB: predicated region body
PF: predicated region fallthrough
CT: control target
= control target key end

     0   :  { %s2311_s0 = inlined_call_operand.vmem [shape: f32[8,3], index: 0, kind: input, shape index: {}]   ;;  %s2312_s1 = inlined_call_operand.vmem [shape: f32[3,256], index: 1, kind: input, shape index: {}]   ;;  %s2313_s2 = inlined_call_operand.hbm [shape: f32[1,256], index: 2, kind: input, shape index: {}]   ;;  %s2314_s3 = inlined_call_operand.hbm [shape: bf16[128,256], index: 3, kind: input, shape index: {}]   ;;  %s2315_s4 = inlined_call_operand.hbm [shape: bf16[128,256], index: 4, kind: input, shape index: {}]   ;;  %s2316_s5 = inlined_call_operand.hbm [shape: bf16[1,256,256], index: 5, kind: input, shape index: {}]   ;;  %s2317_s6 = inlined_call_operand.hbm [shape: bf16[1,256,256], index: 6, kind: input, shape index: {}]   ;;  %s2318_s7 = inlined_call_operand.vmem [shape: f32[2,1,256], index: 7, kind: input, shape index: {}]   ;;  %s2319_s8 = inlined_call_operand.vmem [shape: f32[2,1,256], index: 8, kind: input, shape index: {}]   ;;  %s2320_s9 = inlined_call_operand.vmem [shape: f32[2,1,256], index: 9, kind: input, shape index: {}]   ;;  %s2321_s10 = inlined_call_operand.vmem [shape: f32[1,256], index: 10, kind: input, shape index: {}]   ;;  %s2322_s11 = inlined_call_operand.<no memory space> [shape: f32[1,1], index: 11, kind: input, shape index: {}]   ;;  %s2323_s12 = inlined_call_operand.vmem [shape: f32[8,1], index: 12, kind: output, shape index: {}]  }
   0x1   :  { %v17_v0 = vstv %s2322_s11 }
   0x2   :  { %18 = vst [vmem:[#allocation2] sm:$0x1] %v17_v0 }
   0x3   :  { %19 = vsyncpa [#allocation4], 0 }
   0x4   :  { %20 = vsyncpa [#allocation6], 0  ;;  %s41_s25 = sshll.u32 %s2314_s3, 4  ;;  %s42_s25 = int_to_ptr.hbm [resolvable:$true] %s41_s25 }
   0x5   :  { %21 = vsyncpa [#allocation9], 0  ;;  %s1920_s26 = smov [#allocation5]   ;;  %s67_s30 = sshll.u32 %s2316_s5, 4  ;;  %s68_s30 = int_to_ptr.hbm [resolvable:$true] %s67_s30 }
   0x6   :  { %s43_s27 = sshll.u32 %s1920_s26, 4  ;;  %s1921_s13 = smov 128   ;;  %s44_s27 = int_to_ptr.vmem [resolvable:$true] %s43_s27 }
   0x7   :  { %s1922_s14 = smov 8   ;;  %s1923_s11 = smov [#allocation8]  }
   0x8   :  { %49 = dma.hbm_to_vmem [thread:$0]  %s42_s25, 2048, %s44_s27, [#allocation6], %s1921_s13, %s1921_s13, %s1922_s14  }
   0x9   :  { %s69_s15 = sshll.u32 %s1923_s11, 4  ;;  %s31_s18 = sshll.u32 %s2313_s2, 4  ;;  %s70_s15 = int_to_ptr.vmem [resolvable:$true] %s69_s15  ;;  %s32_s18 = int_to_ptr.hbm [resolvable:$true] %s31_s18 }
   0xa   :  { %75 = dma.hbm_to_vmem [thread:$0]  %s68_s30, 4096, %s70_s15, [#allocation9], %s1921_s13, %s1921_s13, %s1922_s14  }
   0xb   :  { %s54_s20 = sshll.u32 %s2315_s4, 4  ;;  %s1924_s21 = smov [#allocation3]   ;;  %s55_s20 = int_to_ptr.hbm [resolvable:$true] %s54_s20 }
   0xc   :  { %s33_s22 = sshll.u32 %s1924_s21, 4  ;;  %s1925_s5 = smov [#allocation7]   ;;  %s34_s22 = int_to_ptr.vmem [resolvable:$true] %s33_s22 }
   0xd   :  { %36 = dma.hbm_to_vmem [thread:$0]  %s32_s18, 32, %s34_s22, [#allocation4]  }
   0xe   :  { %s56_s23 = sshll.u32 %s1925_s5, 4  ;;  %s80_s26 = sshll.u32 %s2317_s6, 4  ;;  %s57_s23 = int_to_ptr.vmem [resolvable:$true] %s56_s23  ;;  %s81_s26 = int_to_ptr.hbm [resolvable:$true] %s80_s26 }
   0xf   :  { %62 = dma.hbm_to_vmem [thread:$0]  %s55_s20, 2048, %s57_s23, [#allocation6], %s1921_s13, %s1921_s13, %s1922_s14  }
  0x10   :  { %s1926_s2 = smov [#allocation10]  }
  0x11   :  { %s82_s27 = sshll.u32 %s1926_s2, 4  ;;  %s83_s27 = int_to_ptr.vmem [resolvable:$true] %s82_s27 }
  0x12   :  { %88 = dma.hbm_to_vmem [thread:$0]  %s81_s26, 4096, %s83_s27, [#allocation9], %s1921_s13, %s1921_s13, %s1922_s14  }
  0x13   :  { %1914 = dma.done.wait [#allocation4], 32  }
  0x14   :  { %1915 = vsyncadd [#allocation4], 4294967264 }
  0x15   :  { %1916 = dma.done.wait [#allocation6], 4096  }
  0x16   :  { %1917 = vsyncadd [#allocation6], 4294963200 }
  0x17   :  { %1918 = dma.done.wait [#allocation9], 8192  }
  0x18   :  { %1919 = vsyncadd [#allocation9], 4294959104  ;;  %v1927_v1 = vmov 0   ;;  %v1928_v2 = vmov 2   ;;  %v128_v3 = vld [vmem:[%s2311_s0] sm:$0xff]  ;;  %v1929_v33 = vmov 1  }
  0x19   :  { %1765 = vset.pattern.permute.xlu0 %v1927_v1  ;;  %1767 = vset.pattern.permute.xlu1 %v1928_v2  ;;  %v1326_v4 = vld [vmem:[#allocation7 + $0x70] sm:$0xf]  ;;  %v1690_v5 = vld [vmem:[#allocation7 + $0x74] sm:$0xf0]  ;;  %v1689_v7 = vld [vmem:[#allocation7 + $0x74] sm:$0xf] }
  0x1a   :  { %133 = vperm.xlu0 %1765, %v128_v3   ;;  %167 = vperm.xlu1 %1767, %v128_v3   ;;  %v1327_v6 = vor.u32 %v1690_v5, %v1326_v4  ;;  %v1328_v8 = vld [vmem:[#allocation7 + $0x78] sm:$0xf0]  ;;  %v1318_v9 = vld [vmem:[#allocation7 + $0x60] sm:$0xf]  ;;  %v1688_v11 = vld [vmem:[#allocation7 + $0x64] sm:$0xf0] }
  0x1b   :  { %v1331_v10 = vor.u32 %v1689_v7, %v1328_v8  ;;  %v1687_v12 = vld [vmem:[#allocation7 + $0x64] sm:$0xf]  ;;  %v1320_v13 = vld [vmem:[#allocation7 + $0x68] sm:$0xf0]  ;;  %v1319_v14 = vor.u32 %v1688_v11, %v1318_v9  ;;  %v1310_v16 = vld [vmem:[#allocation7 + $0x50] sm:$0xf] }
  0x1c   :  { %296 = vmatpush.bf16.msra.mxu0 %v1327_v6  ;;  %v1323_v15 = vor.u32 %v1687_v12, %v1320_v13  ;;  %v1686_v17 = vld [vmem:[#allocation7 + $0x54] sm:$0xf0]  ;;  %v1685_v18 = vld [vmem:[#allocation7 + $0x54] sm:$0xf]  ;;  %v1312_v19 = vld [vmem:[#allocation7 + $0x58] sm:$0xf0] }
  0x1d   :  { %309 = vmatpush.bf16.msra.mxu1 %v1331_v10  ;;  %v1390_v20 = vld [vmem:[#allocation5 + $0x70] sm:$0xf]  ;;  %v1674_v21 = vld [vmem:[#allocation5 + $0x74] sm:$0xf0]  ;;  %v1673_v22 = vld [vmem:[#allocation5 + $0x74] sm:$0xf]  ;;  %v1311_v24 = vor.u32 %v1686_v17, %v1310_v16  ;;  %v1315_v29 = vor.u32 %v1685_v18, %v1312_v19 }
  0x1e   :  { %v1392_v23 = vld [vmem:[#allocation5 + $0x78] sm:$0xf0]  ;;  %v1302_v25 = vld [vmem:[#allocation7 + $0x40] sm:$0xf]  ;;  %v1684_v26 = vld [vmem:[#allocation7 + $0x44] sm:$0xf0]  ;;  %v2017_v27 = vor.u32 %v1674_v21, %v1390_v20 }
  0x1f   :  { %v2019_v28 = vor.u32 %v1673_v22, %v1392_v23  ;;  %v1683_v30 = vld [vmem:[#allocation7 + $0x44] sm:$0xf]  ;;  %v1382_v31 = vld [vmem:[#allocation5 + $0x60] sm:$0xf]  ;;  %v1672_v32 = vld [vmem:[#allocation5 + $0x64] sm:$0xf0]  ;;  %v1303_v39 = vor.u32 %v1684_v26, %v1302_v25 }
  0x20   :  { %297 = vmatpush.bf16.msra.mxu0 %v1319_v14  ;;  %v1304_v34 = vld [vmem:[#allocation7 + $0x48] sm:$0xf0]  ;;  %402 = vmatpush.bf16.msra.mxu2 %v2017_v27  ;;  %v2022_v35 = vor.u32 %v1672_v32, %v1382_v31  ;;  %v1671_v36 = vld [vmem:[#allocation5 + $0x64] sm:$0xf]  ;;  %v1374_v40 = vld [vmem:[#allocation5 + $0x50] sm:$0xf] }
  0x21   :  { %310 = vmatpush.bf16.msra.mxu1 %v1323_v15  ;;  %v1384_v37 = vld [vmem:[#allocation5 + $0x68] sm:$0xf0]  ;;  %415 = vmatpush.bf16.msra.mxu3 %v2019_v28  ;;  %v1670_v41 = vld [vmem:[#allocation5 + $0x54] sm:$0xf0]  ;;  %v1669_v42 = vld [vmem:[#allocation5 + $0x54] sm:$0xf]  ;;  %v1307_v43 = vor.u32 %v1683_v30, %v1304_v34 }
  0x22   :  { %1766 = vset.pattern.permute.xlu0 %v1929_v33  ;;  %v2025_v38 = vor.u32 %v1671_v36, %v1384_v37  ;;  %v1294_v44 = vld [vmem:[#allocation7 + $0x30] sm:$0xf]  ;;  %v1682_v45 = vld [vmem:[#allocation7 + $0x34] sm:$0xf0]  ;;  %v1376_v46 = vld [vmem:[#allocation5 + $0x58] sm:$0xf0]  ;;  %v2028_v49 = vor.u32 %v1670_v41, %v1374_v40 }
  0x23   :  { %153 = vperm.xlu0 %1766, %v128_v3   ;;  %v1681_v47 = vld [vmem:[#allocation7 + $0x34] sm:$0xf]  ;;  %v1296_v48 = vld [vmem:[#allocation7 + $0x38] sm:$0xf0]  ;;  %v2031_v50 = vor.u32 %v1669_v42, %v1376_v46  ;;  %v1366_v51 = vld [vmem:[#allocation5 + $0x40] sm:$0xf]  ;;  %v1295_v53 = vor.u32 %v1682_v45, %v1294_v44 }
  0x24   :  { %298 = vmatpush.bf16.msra.mxu0 %v1311_v24  ;;  %403 = vmatpush.bf16.msra.mxu2 %v2022_v35  ;;  %v1668_v52 = vld [vmem:[#allocation5 + $0x44] sm:$0xf0]  ;;  %v1667_v54 = vld [vmem:[#allocation5 + $0x44] sm:$0xf]  ;;  %v1368_v55 = vld [vmem:[#allocation5 + $0x48] sm:$0xf0]  ;;  %v1299_v56 = vor.u32 %v1681_v47, %v1296_v48 }
  0x25   :  { %311 = vmatpush.bf16.msra.mxu1 %v1315_v29  ;;  %416 = vmatpush.bf16.msra.mxu3 %v2025_v38  ;;  %v1286_v57 = vld [vmem:[#allocation7 + $0x20] sm:$0xf]  ;;  %v1680_v58 = vld [vmem:[#allocation7 + $0x24] sm:$0xf0]  ;;  %v1679_v59 = vld [vmem:[#allocation7 + $0x24] sm:$0xf]  ;;  %v2034_v61 = vor.u32 %v1668_v52, %v1366_v51  ;;  %v2037_v62 = vor.u32 %v1667_v54, %v1368_v55 }
  0x26   :  { %v1288_v60 = vld [vmem:[#allocation7 + $0x28] sm:$0xf0]  ;;  %v1287_v63 = vor.u32 %v1680_v58, %v1286_v57  ;;  %v1278_v1 = vld [vmem:[#allocation7 + $0x10] sm:$0xf]  ;;  %v1678_v3 = vld [vmem:[#allocation7 + $0x14] sm:$0xf0] }
  0x27   :  { %v1291_v0 = vor.u32 %v1679_v59, %v1288_v60  ;;  %v1677_v4 = vld [vmem:[#allocation7 + $0x14] sm:$0xf]  ;;  %v1280_v5 = vld [vmem:[#allocation7 + $0x18] sm:$0xf0]  ;;  %v1279_v6 = vor.u32 %v1678_v3, %v1278_v1  ;;  %v1270_v8 = vld [vmem:[#allocation7] sm:$0xf] }
  0x28   :  { %299 = vmatpush.bf16.msra.mxu0 %v1303_v39  ;;  %404 = vmatpush.bf16.msra.mxu2 %v2028_v49  ;;  %v1283_v7 = vor.u32 %v1677_v4, %v1280_v5  ;;  %v1675_v9 = vld [vmem:[#allocation7 + $0x4] sm:$0xf]  ;;  %v1272_v11 = vld [vmem:[#allocation7 + $0x8] sm:$0xf0]  ;;  %v1358_v12 = vld [vmem:[#allocation5 + $0x30] sm:$0xf] }
  0x29   :  { %312 = vmatpush.bf16.msra.mxu1 %v1307_v43  ;;  %417 = vmatpush.bf16.msra.mxu3 %v2031_v50  ;;  %v1666_v13 = vld [vmem:[#allocation5 + $0x34] sm:$0xf0]  ;;  %v1275_v14 = vor.u32 %v1675_v9, %v1272_v11  ;;  %v1665_v16 = vld [vmem:[#allocation5 + $0x34] sm:$0xf]  ;;  %v1360_v17 = vld [vmem:[#allocation5 + $0x38] sm:$0xf0] }
  0x2a   :  { %v1359_v15 = vor.u32 %v1666_v13, %v1358_v12  ;;  %v1363_v18 = vor.u32 %v1665_v16, %v1360_v17  ;;  %v1350_v19 = vld [vmem:[#allocation5 + $0x20] sm:$0xf]  ;;  %v1664_v20 = vld [vmem:[#allocation5 + $0x24] sm:$0xf0]  ;;  %v1663_v21 = vld [vmem:[#allocation5 + $0x24] sm:$0xf] }
  0x2b   :  { %1768 = vset.pattern.permute.xlu0 %v1928_v2  ;;  %v1676_v2 = vld [vmem:[#allocation7 + $0x4] sm:$0xf0]  ;;  %v1351_v22 = vor.u32 %v1664_v20, %v1350_v19  ;;  %v1352_v23 = vld [vmem:[#allocation5 + $0x28] sm:$0xf0]  ;;  %v1342_v25 = vld [vmem:[#allocation5 + $0x10] sm:$0xf] }
  0x2c   :  { %300 = vmatpush.bf16.msra.mxu0 %v1295_v53  ;;  %405 = vmatpush.bf16.msra.mxu2 %v2034_v61  ;;  %v1271_v10 = vor.u32 %v1676_v2, %v1270_v8  ;;  %v1355_v24 = vor.u32 %v1663_v21, %v1352_v23  ;;  %v1662_v26 = vld [vmem:[#allocation5 + $0x14] sm:$0xf0]  ;;  %v1661_v29 = vld [vmem:[#allocation5 + $0x14] sm:$0xf]  ;;  %v1344_v31 = vld [vmem:[#allocation5 + $0x18] sm:$0xf0]  ;;  %v119_v21 = vlaneseq }
  0x2d   :  { %313 = vmatpush.bf16.msra.mxu1 %v1299_v56  ;;  %418 = vmatpush.bf16.msra.mxu3 %v2037_v62  ;;  %v1343_v30 = vor.u32 %v1662_v26, %v1342_v25  ;;  %v1347_v32 = vor.u32 %v1661_v29, %v1344_v31  ;;  %v1660_v33 = vld [vmem:[#allocation5 + $0x4] sm:$0xf0]  ;;  %v1336_v36 = vld [vmem:[#allocation5 + $0x8] sm:$0xf0]  ;;  %v2053_v37 = vld [vmem:[%s2312_s1] sm:$0x77] }
  0x2e   :  { %v130_v39 = vld [vmem:[#allocation3] sm:$0x3]  ;;  %v137_v41 = vperm.slane %v2053_v37, 0  ;;  %v156_v46 = vperm.slane %v2053_v37, 1  ;;  %v170_v47 = vperm.slane %v2053_v37, 2 }
  0x2f   :  { %v147_v42 = vperm.slane %v130_v39, 1 }
  0x30   :  { %301 = vmatpush.bf16.msra.mxu0 %v1287_v63  ;;  %406 = vmatpush.bf16.msra.mxu2 %v1359_v15  ;;  %v141_v45 = vperm.slane %v137_v41, 0  ;;  %v160_v51 = vperm.slane %v156_v46, 1  ;;  %v174_v52 = vperm.slane %v170_v47, 2  ;;  %v1754_v41 = vld [vmem:[#allocation10 + $0xf4] sm:$0xf0] }
  0x31   :  { %314 = vmatpush.bf16.msra.mxu1 %v1291_v0  ;;  %419 = vmatpush.bf16.msra.mxu3 %v1363_v18  ;;  %v1753_v46 = vld [vmem:[#allocation10 + $0xf4] sm:$0xf]  ;;  %v1522_v47 = vld [vmem:[#allocation10 + $0xf8] sm:$0xf0] }
  0x34   :  { %302 = vmatpush.bf16.msra.mxu0 %v1279_v6  ;;  %407 = vmatpush.bf16.msra.mxu2 %v1351_v22 }
  0x35   :  { %315 = vmatpush.bf16.msra.mxu1 %v1283_v7  ;;  %420 = vmatpush.bf16.msra.mxu3 %v1355_v24  ;;  %v456_v7 = vld [vmem:[%s2318_s7] sm:$0x3] }
  0x36   :  { %v459_v11 = vperm.slane %v456_v7, 1  ;;  %v458_v12 = vperm.slane %v456_v7, 0  ;;  %v1733_v7 = vld [vmem:[#allocation10 + $0x54] sm:$0xf] }
  0x38   :  { %303 = vmatpush.bf16.msra.mxu0 %v1271_v10  ;;  %408 = vmatpush.bf16.msra.mxu2 %v1343_v30 }
  0x39   :  { %316 = vmatpush.bf16.msra.mxu1 %v1275_v14  ;;  %421 = vmatpush.bf16.msra.mxu3 %v1347_v32 }
  0x3c   :  { %428 = vmatpush.bf16.msrb.mxu0 %v2017_v27  ;;  %v1334_v27 = vld [vmem:[#allocation5] sm:$0xf] }
  0x3d   :  { %441 = vmatpush.bf16.msrb.mxu1 %v2019_v28  ;;  %v1659_v28 = vld [vmem:[#allocation5 + $0x4] sm:$0xf]  ;;  %v1335_v34 = vor.u32 %v1660_v33, %v1334_v27 }
  0x3f   :  { %409 = vmatpush.bf16.msra.mxu2 %v1335_v34 }
  0x40   :  { %429 = vmatpush.bf16.msrb.mxu0 %v2022_v35  ;;  %v1339_v35 = vor.u32 %v1659_v28, %v1336_v36 }
  0x41   :  { %442 = vmatpush.bf16.msrb.mxu1 %v2025_v38  ;;  %v138_v38 = vperm.slane %v2053_v37, 4 }
  0x42   :  { %422 = vmatpush.bf16.msra.mxu3 %v1339_v35 }
  0x43   :  { %v142_v40 = vperm.slane %v138_v38, 0  ;;  %v1738_v38 = vld [vmem:[#allocation10 + $0x74] sm:$0xf0] }
  0x44   :  { %430 = vmatpush.bf16.msrb.mxu0 %v2028_v49  ;;  %v146_v49 = vperm.slane %v130_v39, 0  ;;  %v1520_v39 = vld [vmem:[#allocation10 + $0xf0] sm:$0xf] }
  0x45   :  { %443 = vmatpush.bf16.msrb.mxu1 %v2031_v50 }
  0x48   :  { %431 = vmatpush.bf16.msrb.mxu0 %v2034_v61 }
  0x49   :  { %444 = vmatpush.bf16.msrb.mxu1 %v2037_v62 }
  0x4c   :  { %432 = vmatpush.bf16.msrb.mxu0 %v1359_v15 }
  0x4d   :  { %445 = vmatpush.bf16.msrb.mxu1 %v1363_v18 }
  0x50   :  { %433 = vmatpush.bf16.msrb.mxu0 %v1351_v22  ;;  %v2075_v22 = vand.u32 127, %v119_v21 }
  0x51   :  { %446 = vmatpush.bf16.msrb.mxu1 %v1355_v24 }
  0x52   :  { %v121_v25 = vadd.s32 128, %v2075_v22  ;;  %vm126_vm0 = vcmp.lt.s32.totalorder %v2075_v22, 100 }
  0x54   :  { %434 = vmatpush.bf16.msrb.mxu0 %v1343_v30  ;;  %v125_v31 = vand.u32 127, %v121_v25 }
  0x55   :  { %447 = vmatpush.bf16.msrb.mxu1 %v1347_v32 }
  0x56   :  { %vm2085_vm1 = vcmp.lt.s32.totalorder %v125_v31, 100 }
  0x58   :  { %435 = vmatpush.bf16.msrb.mxu0 %v1335_v34 }
  0x59   :  { %448 = vmatpush.bf16.msrb.mxu1 %v1339_v35  ;;  %v1456_v35 = vld [vmem:[#allocation10 + $0x70] sm:$0xf] }
  0x8c   :  { %v134_v43 = vpop.permute.xlu0 %133  ;;  %v2061_v53 = vpop.permute.xlu1 %167 }
  0x8d   :  { %v144_v44 = vmul.f32 %v142_v40, %v134_v43  ;;  %v143_v50 = vmul.f32 %v141_v45, %v134_v43  ;;  %v176_v57 = vmul.f32 %v174_v52, %v2061_v53  ;;  %v1457_v40 = vor.u32 %v1738_v38, %v1456_v35  ;;  %v1458_v43 = vld [vmem:[#allocation10 + $0x78] sm:$0xf0]  ;;  %v1512_v52 = vld [vmem:[#allocation10 + $0xe0] sm:$0xf] }
  0x8f   :  { %v2059_v48 = vadd.f32 %v147_v42, %v144_v44  ;;  %v150_v55 = vadd.f32 %v146_v49, %v143_v50  ;;  %v1737_v42 = vld [vmem:[#allocation10 + $0x74] sm:$0xf]  ;;  %v1521_v44 = vor.u32 %v1754_v41, %v1520_v39  ;;  %812 = vmatpush.bf16.msrb.mxu2 %v1457_v40  ;;  %v1525_v49 = vor.u32 %v1753_v46, %v1522_v47  ;;  %v1448_v50 = vld [vmem:[#allocation10 + $0x60] sm:$0xf]  ;;  %v1490_v41 = vld [vmem:[#allocation10 + $0xb8] sm:$0xf0] }
  0x90   :  { %v1461_v45 = vor.u32 %v1737_v42, %v1458_v43  ;;  %v1745_v40 = vld [vmem:[#allocation10 + $0xb4] sm:$0xf] }
  0x91   :  { %825 = vmatpush.bf16.msrb.mxu3 %v1521_v44  ;;  %v1493_v43 = vor.u32 %v1745_v40, %v1490_v41  ;;  %v1416_v44 = vld [vmem:[#allocation10 + $0x20] sm:$0xf]  ;;  %v1586_v40 = vld [vmem:[#allocation8 + $0x78] sm:$0xf0]  ;;  %v1721_v41 = vld [vmem:[#allocation8 + $0xf4] sm:$0xf] }
  0x95   :  { %v2063_v54 = vpop.permute.xlu0 %153 }
  0x96   :  { %v162_v56 = vmul.f32 %v160_v51, %v2063_v54  ;;  %v1736_v51 = vld [vmem:[#allocation10 + $0x64] sm:$0xf0] }
  0x98   :  { %v164_v58 = vadd.f32 %v162_v56, %v150_v55  ;;  %v1449_v55 = vor.u32 %v1736_v51, %v1448_v50  ;;  %v1752_v56 = vld [vmem:[#allocation10 + $0xe4] sm:$0xf0] }
  0x99   :  { %v1744_v50 = vld [vmem:[#allocation10 + $0xa4] sm:$0xf0] }
  0x9a   :  { %v2067_v59 = vadd.f32 %v176_v57, %v164_v58  ;;  %v1735_v57 = vld [vmem:[#allocation10 + $0x64] sm:$0xf]  ;;  %v1450_v58 = vld [vmem:[#allocation10 + $0x68] sm:$0xf0]  ;;  %813 = vmatpush.bf16.msrb.mxu2 %v1449_v55 }
  0x9b   :  { %v1418_v55 = vld [vmem:[#allocation10 + $0x28] sm:$0xf0] }
  0x9c   :  { %v212_v60 = vpack.c.bf16 %v2067_v59, %v2067_v59 }
  0x9e   :  { %304 = vmatmul.bf16.vlgmr.msra.gmra.mxu0 %v212_v60  ;;  %317 = vmatmul.bf16.vlgmr.msra.gmra.mxu1 %v212_v60  ;;  %v213_v61 = vunpack.c.l.bf16 %v212_v60 }
  0x9f   :  { %410 = vmatmul.bf16.vlgmr.msra.gmra.mxu2 %v212_v60  ;;  %423 = vmatmul.bf16.vlgmr.msra.gmra.mxu3 %v212_v60  ;;  %v1513_v60 = vor.u32 %v1752_v56, %v1512_v52  ;;  %v1727_v52 = vld [vmem:[#allocation10 + $0x24] sm:$0xf] }
  0xa0   :  { %v214_v62 = vsub.f32 %v2067_v59, %v213_v61  ;;  %838 = vmatpush.bf16.msra.mxu0 %v1461_v45  ;;  %851 = vmatpush.bf16.msra.mxu1 %v1525_v49  ;;  %v1453_v61 = vor.u32 %v1735_v57, %v1450_v58  ;;  %v1728_v45 = vld [vmem:[#allocation10 + $0x24] sm:$0xf0]  ;;  %v1480_v49 = vld [vmem:[#allocation10 + $0xa0] sm:$0xf]  ;;  %v1743_v56 = vld [vmem:[#allocation10 + $0xa4] sm:$0xf]  ;;  %v1421_v57 = vor.u32 %v1727_v52, %v1418_v55 }
  0xa1   :  { %826 = vmatpush.bf16.msrb.mxu3 %v1513_v60  ;;  %v1417_v47 = vor.u32 %v1728_v45, %v1416_v44  ;;  %v1481_v51 = vor.u32 %v1744_v50, %v1480_v49  ;;  %v1482_v58 = vld [vmem:[#allocation10 + $0xa8] sm:$0xf0]  ;;  %v2116_v44 = vld [vmem:[%s2319_s8] sm:$0x3]  ;;  %v1704_v52 = vld [vmem:[#allocation8 + $0x64] sm:$0xf0] }
  0xa2   :  { %v215_v63 = vpack.c.bf16 %v214_v62, %v214_v62  ;;  %v1751_v62 = vld [vmem:[#allocation10 + $0xe4] sm:$0xf]  ;;  %v1485_v60 = vor.u32 %v1743_v56, %v1482_v58  ;;  %v2121_v45 = vld [vmem:[%s2320_s9] sm:$0x3]  ;;  %v1640_v56 = vld [vmem:[#allocation8 + $0xe0] sm:$0xf] }
  0xa3   :  { %v1703_v58 = vld [vmem:[#allocation8 + $0x64] sm:$0xf] }
  0xa4   :  { %839 = vmatpush.bf16.msra.mxu0 %v1453_v61  ;;  %v1408_v61 = vld [vmem:[#allocation10 + $0x10] sm:$0xf] }
  0xae   :  { %436 = vmatmul.bf16.vlgmr.msrb.gmra.mxu0 %v215_v63  ;;  %449 = vmatmul.bf16.vlgmr.msrb.gmra.mxu1 %v215_v63  ;;  %v1514_v63 = vld [vmem:[#allocation10 + $0xe8] sm:$0xf0] }
 0x11b   :  { %v305_v0 = vpop.f32.mrf.mxu0  ;;  %v318_v1 = vpop.f32.mrf.mxu1 }
 0x122   :  { %v411_v3 = vpop.f32.mrf.mxu2  ;;  %v424_v4 = vpop.f32.mrf.mxu3 }
 0x123   :  { %v307_v5 = vpop.f32.mrf.mxu0  ;;  %v320_v6 = vpop.f32.mrf.mxu1  ;;  %v412_v8 = vadd.f32 %v411_v3, %v305_v0  ;;  %v425_v2 = vadd.f32 %v424_v4, %v318_v1  ;;  %v1517_v0 = vor.u32 %v1751_v62, %v1514_v63  ;;  %v1440_v1 = vld [vmem:[#allocation10 + $0x50] sm:$0xf]  ;;  %v1734_v3 = vld [vmem:[#allocation10 + $0x54] sm:$0xf0] }
 0x124   :  { %v1504_v4 = vld [vmem:[#allocation10 + $0xd0] sm:$0xf]  ;;  %v1441_v5 = vor.u32 %v1734_v3, %v1440_v1  ;;  %v1750_v6 = vld [vmem:[#allocation10 + $0xd4] sm:$0xf0]  ;;  %v1725_v3 = vld [vmem:[#allocation10 + $0x14] sm:$0xf] }
 0x125   :  { %852 = vmatpush.bf16.msra.mxu1 %v1517_v0  ;;  %v1726_v62 = vld [vmem:[#allocation10 + $0x14] sm:$0xf0]  ;;  %v1472_v63 = vld [vmem:[#allocation10 + $0x90] sm:$0xf] }
 0x126   :  { %814 = vmatpush.bf16.msrb.mxu2 %v1441_v5  ;;  %v1409_v0 = vor.u32 %v1726_v62, %v1408_v61  ;;  %v1742_v1 = vld [vmem:[#allocation10 + $0x94] sm:$0xf0] }
 0x12a   :  { %v413_v9 = vpop.f32.mrf.mxu2  ;;  %v426_v10 = vpop.f32.mrf.mxu3 }
 0x12b   :  { %v437_v13 = vpop.f32.mrf.mxu0  ;;  %v450_v14 = vpop.f32.mrf.mxu1  ;;  %v1749_v10 = vld [vmem:[#allocation10 + $0xd4] sm:$0xf] }
 0x12c   :  { %v454_v15 = vadd.f32 %v437_v13, %v412_v8  ;;  %v455_v16 = vadd.f32 %v450_v14, %v425_v2  ;;  %v1442_v8 = vld [vmem:[#allocation10 + $0x58] sm:$0xf0]  ;;  %v1505_v2 = vor.u32 %v1750_v6, %v1504_v4  ;;  %v1432_v13 = vld [vmem:[#allocation10 + $0x40] sm:$0xf]  ;;  %v1732_v14 = vld [vmem:[#allocation10 + $0x44] sm:$0xf0]  ;;  %v1473_v6 = vor.u32 %v1742_v1, %v1472_v63 }
 0x12d   :  { %v1445_v9 = vor.u32 %v1733_v7, %v1442_v8  ;;  %v1410_v4 = vld [vmem:[#allocation10 + $0x18] sm:$0xf0]  ;;  %v1741_v8 = vld [vmem:[#allocation10 + $0x94] sm:$0xf]  ;;  %v1578_v63 = vld [vmem:[#allocation8 + $0x68] sm:$0xf0] }
 0x12e   :  { %v463_v17 = vadd.f32 %v459_v11, %v455_v16  ;;  %v462_v18 = vadd.f32 %v458_v12, %v454_v15  ;;  %v1506_v11 = vld [vmem:[#allocation10 + $0xd8] sm:$0xf0]  ;;  %827 = vmatpush.bf16.msrb.mxu3 %v1505_v2  ;;  %v1496_v15 = vld [vmem:[#allocation10 + $0xc0] sm:$0xf]  ;;  %v1433_v16 = vor.u32 %v1732_v14, %v1432_v13  ;;  %v1413_v7 = vor.u32 %v1725_v3, %v1410_v4  ;;  %v1724_v13 = vld [vmem:[#allocation10 + $0x4] sm:$0xf0] }
 0x12f   :  { %v1509_v12 = vor.u32 %v1749_v10, %v1506_v11  ;;  %840 = vmatpush.bf16.msra.mxu0 %v1445_v9  ;;  %v1474_v2 = vld [vmem:[#allocation10 + $0x98] sm:$0xf0]  ;;  %v157_v9 = vperm.slane %v2053_v37, 5  ;;  %v1464_v14 = vld [vmem:[#allocation10 + $0x80] sm:$0xf]  ;;  %v2139_v3 = vor.u32 %v1703_v58, %v1578_v63 }
 0x130   :  { %466 = vadd.xlane.f32.xlu2 %v463_v17  ;;  %464 = vadd.xlane.f32.xlu1 %v462_v18  ;;  %v1477_v11 = vor.u32 %v1741_v8, %v1474_v2  ;;  %v1642_v4 = vld [vmem:[#allocation8 + $0xe8] sm:$0xf0]  ;;  %v1632_v2 = vld [vmem:[#allocation8 + $0xd0] sm:$0xf]  ;;  %v1714_v58 = vld [vmem:[#allocation8 + $0xb4] sm:$0xf0] }
 0x131   :  { %853 = vmatpush.bf16.msra.mxu1 %v1509_v12  ;;  %815 = vmatpush.bf16.msrb.mxu2 %v1433_v16  ;;  %v1400_v12 = vld [vmem:[#allocation10] sm:$0xf] }
 0x133   :  { %v439_v19 = vpop.f32.mrf.mxu0  ;;  %v452_v20 = vpop.f32.mrf.mxu1 }
 0x134   :  { %v1434_v19 = vld [vmem:[#allocation10 + $0x48] sm:$0xf0] }
 0x1a3   :  { %v467_v23 = vpop.xlane.xlu2 %466  ;;  %v465_v24 = vpop.xlane.xlu1 %464 }
 0x1a4   :  { %v474_v26 = vmul.f32 0.01, %v465_v24  ;;  %v475_v29 = vmul.f32 0.01, %v467_v23  ;;  %v1747_v23 = vld [vmem:[#allocation10 + $0xc4] sm:$0xf] }
 0x1a5   :  { %v1498_v24 = vld [vmem:[#allocation10 + $0xc8] sm:$0xf0] }
 0x1a6   :  { %v476_v30 = vsub.f32 %v462_v18, %v474_v26  ;;  %v477_v33 = vsub.f32 %v463_v17, %v475_v29  ;;  %v1748_v17 = vld [vmem:[#allocation10 + $0xc4] sm:$0xf0]  ;;  %v1731_v18 = vld [vmem:[#allocation10 + $0x44] sm:$0xf]  ;;  %v1501_v25 = vor.u32 %v1747_v23, %v1498_v24  ;;  %v1424_v26 = vld [vmem:[#allocation10 + $0x30] sm:$0xf] }
 0x1a7   :  { %v1497_v20 = vor.u32 %v1748_v17, %v1496_v15  ;;  %v1437_v21 = vor.u32 %v1731_v18, %v1434_v19  ;;  %v1730_v29 = vld [vmem:[#allocation10 + $0x34] sm:$0xf0]  ;;  %v1401_v17 = vor.u32 %v1724_v13, %v1400_v12  ;;  %v1740_v18 = vld [vmem:[#allocation10 + $0x84] sm:$0xf0]  ;;  %v1723_v19 = vld [vmem:[#allocation10 + $0x4] sm:$0xf] }
 0x1a8   :  { %v2081_v32 = vsel %vm126_vm0, %v476_v30, 0.0  ;;  %v2091_v34 = vsel %vm2085_vm1, %v477_v33, 0.0  ;;  %v1488_v30 = vld [vmem:[#allocation10 + $0xb0] sm:$0xf]  ;;  %854 = vmatpush.bf16.msra.mxu1 %v1501_v25  ;;  %v1425_v31 = vor.u32 %v1730_v29, %v1424_v26  ;;  %v1729_v33 = vld [vmem:[#allocation10 + $0x34] sm:$0xf] }
 0x1a9   :  { %v484_v27 = vmul.f32 %v2081_v32, %v2081_v32  ;;  %v487_v36 = vmul.f32 %v2091_v34, %v2091_v34  ;;  %828 = vmatpush.bf16.msrb.mxu3 %v1497_v20  ;;  %841 = vmatpush.bf16.msra.mxu0 %v1437_v21  ;;  %v1465_v21 = vor.u32 %v1740_v18, %v1464_v14  ;;  %v1402_v23 = vld [vmem:[#allocation10 + $0x8] sm:$0xf0]  ;;  %v1739_v24 = vld [vmem:[#allocation10 + $0x84] sm:$0xf]  ;;  %v528_v12 = vperm.slane %v2121_v45, 0 }
 0x1aa   :  { %816 = vmatpush.bf16.msrb.mxu2 %v1425_v31  ;;  %v1466_v25 = vld [vmem:[#allocation10 + $0x88] sm:$0xf0]  ;;  %v1405_v26 = vor.u32 %v1723_v19, %v1402_v23  ;;  %v1706_v31 = vld [vmem:[#allocation8 + $0x74] sm:$0xf0]  ;;  %v1570_v14 = vld [vmem:[#allocation8 + $0x58] sm:$0xf0] }
 0x1ab   :  { %485 = vadd.xlane.f32.xlu2 %v484_v27  ;;  %v1746_v27 = vld [vmem:[#allocation10 + $0xb4] sm:$0xf0]  ;;  %v1469_v29 = vor.u32 %v1739_v24, %v1466_v25  ;;  %v1560_v23 = vld [vmem:[#allocation8 + $0x40] sm:$0xf]  ;;  %v1700_v24 = vld [vmem:[#allocation8 + $0x44] sm:$0xf0] }
 0x1ac   :  { %v1489_v38 = vor.u32 %v1746_v27, %v1488_v30  ;;  %855 = vmatpush.bf16.msra.mxu1 %v1493_v43  ;;  %v1584_v30 = vld [vmem:[#allocation8 + $0x70] sm:$0xf]  ;;  %v2111_v43 = vperm.slane %v157_v9, 1  ;;  %v1718_v9 = vld [vmem:[#allocation8 + $0xd4] sm:$0xf0] }
 0x1ad   :  { %v2155_v13 = vor.u32 %v1718_v9, %v1632_v2  ;;  %v1696_v2 = vld [vmem:[#allocation8 + $0x24] sm:$0xf0]  ;;  %v1608_v9 = vld [vmem:[#allocation8 + $0xa0] sm:$0xf] }
 0x1ae   :  { %829 = vmatpush.bf16.msrb.mxu3 %v1489_v38  ;;  %817 = vmatpush.bf16.msrb.mxu2 %v1417_v47  ;;  %v1705_v38 = vld [vmem:[#allocation8 + $0x74] sm:$0xf] }
 0x1af   :  { %v2124_v49 = vor.u32 %v1705_v38, %v1586_v40 }
 0x1b0   :  { %856 = vmatpush.bf16.msra.mxu1 %v1485_v60  ;;  %v171_v60 = vperm.slane %v2053_v37, 6 }
 0x1b2   :  { %830 = vmatpush.bf16.msrb.mxu3 %v1481_v51  ;;  %818 = vmatpush.bf16.msrb.mxu2 %v1409_v0  ;;  %v1576_v51 = vld [vmem:[#allocation8 + $0x60] sm:$0xf]  ;;  %v1719_v0 = vld [vmem:[#allocation8 + $0xe4] sm:$0xf] }
 0x1b3   :  { %488 = vadd.xlane.f32.xlu2 %v487_v36  ;;  %v1426_v36 = vld [vmem:[#allocation10 + $0x38] sm:$0xf0]  ;;  %v2129_v55 = vor.u32 %v1704_v52, %v1576_v51  ;;  %v2146_v8 = vor.u32 %v1719_v0, %v1642_v4  ;;  %v1697_v0 = vld [vmem:[#allocation8 + $0x34] sm:$0xf] }
 0x1b4   :  { %v1429_v39 = vor.u32 %v1729_v33, %v1426_v36  ;;  %857 = vmatpush.bf16.msra.mxu1 %v1477_v11  ;;  %v2107_v33 = vor.u32 %v1706_v31, %v1584_v30  ;;  %v1648_v36 = vld [vmem:[#allocation8 + $0xf0] sm:$0xf]  ;;  %v520_v11 = vperm.slane %v2116_v44, 0  ;;  %v1716_v30 = vld [vmem:[#allocation8 + $0xc4] sm:$0xf0] }
 0x1b5   :  { %v1699_v31 = vld [vmem:[#allocation8 + $0x44] sm:$0xf]  ;;  %v1554_v4 = vld [vmem:[#allocation8 + $0x38] sm:$0xf0] }
 0x1b6   :  { %842 = vmatpush.bf16.msra.mxu0 %v1429_v39  ;;  %831 = vmatpush.bf16.msrb.mxu3 %v1473_v6  ;;  %v1702_v6 = vld [vmem:[#allocation8 + $0x54] sm:$0xf0] }
 0x1b7   :  { %819 = vmatpush.bf16.msrb.mxu2 %v1401_v17  ;;  %v1717_v17 = vld [vmem:[#allocation8 + $0xd4] sm:$0xf] }
 0x1b8   :  { %858 = vmatpush.bf16.msra.mxu1 %v1469_v29  ;;  %v1624_v29 = vld [vmem:[#allocation8 + $0xc0] sm:$0xf] }
 0x1b9   :  { %v2171_v40 = vor.u32 %v1716_v30, %v1624_v29 }
 0x1ba   :  { %843 = vmatpush.bf16.msra.mxu0 %v1421_v57  ;;  %832 = vmatpush.bf16.msrb.mxu3 %v1465_v21  ;;  %v1720_v57 = vld [vmem:[#allocation8 + $0xe4] sm:$0xf0]  ;;  %v1634_v21 = vld [vmem:[#allocation8 + $0xd8] sm:$0xf0] }
 0x1bb   :  { %1024 = vmatpush.bf16.msra.mxu2 %v2107_v33  ;;  %v2135_v62 = vor.u32 %v1720_v57, %v1640_v56  ;;  %v1616_v57 = vld [vmem:[#allocation8 + $0xb0] sm:$0xf] }
 0x1be   :  { %844 = vmatpush.bf16.msra.mxu0 %v1413_v7 }
 0x1bf   :  { %1025 = vmatpush.bf16.msra.mxu2 %v2129_v55 }
 0x1c2   :  { %845 = vmatpush.bf16.msra.mxu0 %v1405_v26  ;;  %v2164_v26 = vor.u32 %v1717_v17, %v1634_v21  ;;  %v1546_v17 = vld [vmem:[#allocation8 + $0x28] sm:$0xf0] }
 0x1c6   :  { %1050 = vmatpush.bf16.msrb.mxu0 %v2124_v49 }
 0x1ca   :  { %1051 = vmatpush.bf16.msrb.mxu0 %v2139_v3 }
 0x21e   :  { %v486_v35 = vpop.xlane.xlu2 %485 }
 0x21f   :  { %v492_v42 = vmul.f32 0.01, %v486_v35  ;;  %v1722_v35 = vld [vmem:[#allocation8 + $0xf4] sm:$0xf0] }
 0x220   :  { %v2109_v39 = vor.u32 %v1722_v35, %v1648_v36  ;;  %v1562_v36 = vld [vmem:[#allocation8 + $0x48] sm:$0xf0]  ;;  %v1715_v35 = vld [vmem:[#allocation8 + $0xc4] sm:$0xf] }
 0x221   :  { %v2095_v46 = vadd.f32 1e-05, %v492_v42  ;;  %v1650_v42 = vld [vmem:[#allocation8 + $0xf8] sm:$0xf0]  ;;  %v2175_v52 = vor.u32 %v1699_v31, %v1562_v36  ;;  %v1536_v31 = vld [vmem:[#allocation8 + $0x10] sm:$0xf] }
 0x222   :  { %v2126_v50 = vor.u32 %v1721_v41, %v1650_v42  ;;  %1037 = vmatpush.bf16.msra.mxu3 %v2109_v39  ;;  %v1552_v41 = vld [vmem:[#allocation8 + $0x30] sm:$0xf]  ;;  %v1698_v42 = vld [vmem:[#allocation8 + $0x34] sm:$0xf0] }
 0x223   :  { %1770 = vrsqrt.f32 %v2095_v46  ;;  %vm502_vm3 = vweird.f32 %v2095_v46  ;;  %v1710_v36 = vld [vmem:[#allocation8 + $0x94] sm:$0xf0] }
 0x224   :  { %1063 = vmatpush.bf16.msrb.mxu1 %v2126_v50 }
 0x226   :  { %v489_v5 = vpop.xlane.xlu2 %488  ;;  %1038 = vmatpush.bf16.msra.mxu3 %v2135_v62 }
 0x227   :  { %v493_v10 = vmul.f32 0.01, %v489_v5  ;;  %v1568_v5 = vld [vmem:[#allocation8 + $0x50] sm:$0xf] }
 0x228   :  { %1064 = vmatpush.bf16.msrb.mxu1 %v2146_v8 }
 0x229   :  { %v2099_v15 = vpop.eup %1770  ;;  %v2101_v16 = vadd.f32 1e-05, %v493_v10  ;;  %v1701_v10 = vld [vmem:[#allocation8 + $0x54] sm:$0xf] }
 0x22a   :  { %v497_v20 = vmul.f32 %v2099_v15, %v2095_v46  ;;  %vm503_vm2 = vweird.f32 %v2099_v15  ;;  %v2153_v46 = vor.u32 %v1702_v6, %v1568_v5  ;;  %1039 = vmatpush.bf16.msra.mxu3 %v2155_v13  ;;  %v521_v5 = vperm.slane %v2116_v44, 1 }
 0x22b   :  { %1772 = vrsqrt.f32 %v2101_v16  ;;  %vm504_vm4 = vmor %vm502_vm3, %vm503_vm2  ;;  %vm512_vm6 = vweird.f32 %v2101_v16  ;;  %v529_v6 = vperm.slane %v2121_v45, 1  ;;  %v2196_v44 = vor.u32 %v1714_v58, %v1616_v57  ;;  %v1544_v45 = vld [vmem:[#allocation8 + $0x20] sm:$0xf] }
 0x22c   :  { %v498_v27 = vmul.f32 %v2099_v15, %v497_v20  ;;  %v2161_v20 = vor.u32 %v1701_v10, %v1570_v14  ;;  %1026 = vmatpush.bf16.msra.mxu2 %v2153_v46  ;;  %1065 = vmatpush.bf16.msrb.mxu1 %v2164_v26  ;;  %v1695_v14 = vld [vmem:[#allocation8 + $0x24] sm:$0xf] }
 0x22e   :  { %v499_v47 = vmul.f32 0.5, %v498_v27  ;;  %1052 = vmatpush.bf16.msrb.mxu0 %v2161_v20  ;;  %1040 = vmatpush.bf16.msra.mxu3 %v2171_v40 }
 0x230   :  { %v500_v61 = vsub.f32 1.5, %v499_v47  ;;  %v175_v47 = vperm.slane %v171_v60, 2  ;;  %v1713_v60 = vld [vmem:[#allocation8 + $0xb4] sm:$0xf] }
 0x231   :  { %v2137_v1 = vpop.eup %1772 }
 0x232   :  { %v501_v37 = vmul.f32 %v2099_v15, %v500_v61  ;;  %v507_v7 = vmul.f32 %v2137_v1, %v2101_v16  ;;  %vm513_vm5 = vweird.f32 %v2137_v1  ;;  %v163_v61 = vmul.f32 %v2111_v43, %v2063_v54  ;;  %v1618_v16 = vld [vmem:[#allocation8 + $0xb8] sm:$0xf0]  ;;  %1053 = vmatpush.bf16.msrb.mxu0 %v2175_v52  ;;  %1041 = vmatpush.bf16.msra.mxu3 %v2196_v44 }
 0x233   :  { %vm2187_vm7 = vmor %vm512_vm6, %vm513_vm5  ;;  %v2192_v54 = vor.u32 %v1698_v42, %v1552_v41  ;;  %v1538_v41 = vld [vmem:[#allocation8 + $0x18] sm:$0xf0]  ;;  %v1709_v42 = vld [vmem:[#allocation8 + $0x94] sm:$0xf] }
 0x234   :  { %v505_v18 = vsel %vm504_vm4, %v2099_v15, %v501_v37  ;;  %v508_v19 = vmul.f32 %v2137_v1, %v507_v7  ;;  %v2167_v15 = vor.u32 %v1700_v24, %v1560_v23  ;;  %v1711_v24 = vld [vmem:[#allocation8 + $0xa4] sm:$0xf]  ;;  %v1592_v7 = vld [vmem:[#allocation8 + $0x80] sm:$0xf] }
 0x235   :  { %v516_v25 = vmul.f32 %v505_v18, %v2081_v32  ;;  %v1626_v32 = vld [vmem:[#allocation8 + $0xc8] sm:$0xf0]  ;;  %v165_v18 = vadd.f32 %v163_v61, %v2059_v48  ;;  %v2218_v48 = vor.u32 %v1695_v14, %v1546_v17 }
 0x236   :  { %v509_v27 = vmul.f32 0.5, %v508_v19  ;;  %v2177_v56 = vor.u32 %v1715_v35, %v1626_v32  ;;  %1027 = vmatpush.bf16.msra.mxu2 %v2167_v15  ;;  %v177_v19 = vmul.f32 %v175_v47, %v2061_v53  ;;  %v1693_v35 = vld [vmem:[#allocation8 + $0x14] sm:$0xf]  ;;  %v1602_v47 = vld [vmem:[#allocation8 + $0x98] sm:$0xf0] }
 0x237   :  { %v524_v38 = vmul.f32 %v520_v11, %v516_v25  ;;  %v2203_v11 = vor.u32 %v1697_v0, %v1554_v4  ;;  %v2211_v25 = vor.u32 %v1696_v2, %v1544_v45  ;;  %v2230_v61 = vor.u32 %v1693_v35, %v1538_v41  ;;  %v1691_v45 = vld [vmem:[#allocation8 + $0x4] sm:$0xf]  ;;  %v1530_v2 = vld [vmem:[#allocation8 + $0x8] sm:$0xf0] }
 0x238   :  { %v510_v51 = vsub.f32 1.5, %v509_v27  ;;  %1066 = vmatpush.bf16.msrb.mxu1 %v2177_v56  ;;  %v1694_v27 = vld [vmem:[#allocation8 + $0x14] sm:$0xf0] }
 0x239   :  { %v532_v63 = vadd.f32 %v528_v12, %v524_v38  ;;  %v2205_v12 = vor.u32 %v1713_v60, %v1618_v16  ;;  %1054 = vmatpush.bf16.msrb.mxu0 %v2203_v11  ;;  %v179_v38 = vadd.f32 %v177_v19, %v165_v18  ;;  %v1528_v60 = vld [vmem:[#allocation8] sm:$0xf]  ;;  %v1708_v16 = vld [vmem:[#allocation8 + $0x84] sm:$0xf0] }
 0x23a   :  { %v511_v37 = vmul.f32 %v2137_v1, %v510_v51  ;;  %1028 = vmatpush.bf16.msra.mxu2 %v2192_v54  ;;  %v2223_v51 = vor.u32 %v1694_v27, %v1536_v31 }
 0x23b   :  { %v534_v43 = vadd.f32 %v532_v63, %v2067_v59  ;;  %v1712_v59 = vld [vmem:[#allocation8 + $0xa4] sm:$0xf0]  ;;  %v2232_v63 = vor.u32 %v1709_v42, %v1602_v47 }
 0x23c   :  { %v515_v10 = vsel %vm2187_vm7, %v2137_v1, %v511_v37  ;;  %v1610_v1 = vld [vmem:[#allocation8 + $0xa8] sm:$0xf0]  ;;  %v2214_v30 = vor.u32 %v1712_v59, %v1608_v9  ;;  %1067 = vmatpush.bf16.msrb.mxu1 %v2205_v12  ;;  %v1707_v9 = vld [vmem:[#allocation8 + $0x84] sm:$0xf]  ;;  %v2242_v59 = vor.u32 %v1691_v45, %v1530_v2 }
 0x23d   :  { %v1396_v21 = vmul.f32 -1.442695, %v534_v43  ;;  %v517_v23 = vmul.f32 %v515_v10, %v2091_v34  ;;  %v2220_v53 = vor.u32 %v1711_v24, %v1610_v1  ;;  %v1600_v34 = vld [vmem:[#allocation8 + $0x90] sm:$0xf]  ;;  %1055 = vmatpush.bf16.msrb.mxu0 %v2218_v48  ;;  %v2238_v43 = vor.u32 %v1708_v16, %v1592_v7  ;;  %v1594_v10 = vld [vmem:[#allocation8 + $0x88] sm:$0xf0] }
 0x23e   :  { %1029 = vmatpush.bf16.msra.mxu2 %v2211_v25  ;;  %1042 = vmatpush.bf16.msra.mxu3 %v2214_v30  ;;  %v2226_v58 = vor.u32 %v1710_v36, %v1600_v34  ;;  %v2244_v14 = vor.u32 %v1707_v9, %v1594_v10 }
 0x23f   :  { %1774 = vpow2.f32 %v1396_v21  ;;  %v525_v29 = vmul.f32 %v521_v5, %v517_v23  ;;  %v1692_v5 = vld [vmem:[#allocation8 + $0x4] sm:$0xf0] }
 0x240   :  { %1068 = vmatpush.bf16.msrb.mxu1 %v2220_v53  ;;  %v2235_v37 = vor.u32 %v1692_v5, %v1528_v60 }
 0x241   :  { %v533_v32 = vadd.f32 %v529_v6, %v525_v29  ;;  %1056 = vmatpush.bf16.msrb.mxu0 %v2230_v61 }
 0x242   :  { %1030 = vmatpush.bf16.msra.mxu2 %v2223_v51  ;;  %1043 = vmatpush.bf16.msra.mxu3 %v2226_v58 }
 0x243   :  { %v535_v57 = vadd.f32 %v533_v32, %v179_v38 }
 0x244   :  { %1069 = vmatpush.bf16.msrb.mxu1 %v2232_v63 }
 0x245   :  { %v1775_v0 = vpop.eup %1774  ;;  %v1397_v4 = vmul.f32 -1.442695, %v535_v57  ;;  %1057 = vmatpush.bf16.msrb.mxu0 %v2242_v59 }
 0x246   :  { %v542_v6 = vadd.f32 1.0, %v1775_v0  ;;  %1031 = vmatpush.bf16.msra.mxu2 %v2235_v37  ;;  %1044 = vmatpush.bf16.msra.mxu3 %v2238_v43 }
 0x247   :  { %1776 = vpow2.f32 %v1397_v4 }
 0x248   :  { %1778 = vrcp.f32 %v542_v6  ;;  %1070 = vmatpush.bf16.msrb.mxu1 %v2244_v14  ;;  %vm549_vm9 = vweird.f32 %v542_v6  ;;  %v555_v34 = vand.u32 2147483648, %v542_v6  ;;  %v553_v35 = vand.u32 2147483647, %v542_v6 }
 0x24a   :  { %v556_v47 = vor.u32 1.1754944e-38, %v555_v34  ;;  %vm554_vm14 = vcmp.eq.f32.partialorder %v553_v35, 8.507059e+37 }
 0x24d   :  { %v1777_v17 = vpop.eup %1776 }
 0x24e   :  { %v1779_v18 = vpop.eup %1778  ;;  %v543_v19 = vadd.f32 1.0, %v1777_v17 }
 0x24f   :  { %v545_v21 = vmul.f32 %v1779_v18, %v542_v6  ;;  %vm550_vm8 = vweird.f32 %v1779_v18 }
 0x250   :  { %1780 = vrcp.f32 %v543_v19  ;;  %v570_v36 = vand.u32 2147483648, %v543_v19  ;;  %v568_v32 = vand.u32 2147483647, %v543_v19  ;;  %vm551_vm11 = vmor %vm549_vm9, %vm550_vm8  ;;  %vm564_vm12 = vweird.f32 %v543_v19 }
 0x251   :  { %v546_v23 = vsub.f32 1.0, %v545_v21 }
 0x252   :  { %v571_v57 = vor.u32 1.1754944e-38, %v570_v36  ;;  %vm569_vm15 = vcmp.eq.f32.partialorder %v568_v32, 8.507059e+37 }
 0x253   :  { %v547_v24 = vmul.f32 %v1779_v18, %v546_v23 }
 0x255   :  { %v548_v31 = vadd.f32 %v1779_v18, %v547_v24 }
 0x256   :  { %v1781_v1 = vpop.eup %1780 }
 0x257   :  { %v560_v29 = vmul.f32 %v1781_v1, %v543_v19  ;;  %vm565_vm10 = vweird.f32 %v1781_v1  ;;  %v552_v41 = vsel %vm551_vm11, %v1779_v18, %v548_v31 }
 0x258   :  { %vm566_vm13 = vmor %vm564_vm12, %vm565_vm10  ;;  %v2250_v4 = vsel %vm554_vm14, %v556_v47, %v552_v41  ;;  %vm1259_vm14 = vcmask 7168  }
 0x259   :  { %v561_v27 = vsub.f32 1.0, %v560_v29 }
 0x25b   :  { %v562_v38 = vmul.f32 %v1781_v1, %v561_v27 }
 0x25d   :  { %v563_v42 = vadd.f32 %v1781_v1, %v562_v38 }
 0x25f   :  { %v567_v0 = vsel %vm566_vm13, %v1781_v1, %v563_v42 }
 0x260   :  { %v2252_v60 = vsel %vm569_vm15, %v571_v57, %v567_v0 }
 0x261   :  { %v638_v5 = vpack.c.bf16 %v2252_v60, %v2250_v4 }
 0x263   :  { %v646_v6 = vunpack.c.l.b16 %v638_v5  ;;  %v647_v7 = vunpack.c.h.b16 %v638_v5 }
 0x265   :  { %v648_v16 = vpack.c.b16 %v646_v6, %v646_v6  ;;  %v649_v45 = vpack.c.b16 %v647_v7, %v647_v7 }
 0x267   :  { %820 = vmatmul.bf16.vlgmr.msrb.gmra.mxu2 %v648_v16  ;;  %833 = vmatmul.bf16.vlgmr.msrb.gmra.mxu3 %v649_v45 }
 0x268   :  { %846 = vmatmul.bf16.vlgmr.msra.gmra.mxu0 %v648_v16  ;;  %859 = vmatmul.bf16.vlgmr.msra.gmra.mxu1 %v649_v45 }
 0x269   :  { %1076 = vmatpush.bf16.msrb.mxu2 %v2107_v33  ;;  %1089 = vmatpush.bf16.msrb.mxu3 %v2109_v39  ;;  %v639_v33 = vunpack.c.l.bf16 %v638_v5  ;;  %v640_v39 = vunpack.c.h.bf16 %v638_v5 }
 0x26a   :  { %1102 = vmatpush.bf16.msra.mxu0 %v2124_v49  ;;  %1115 = vmatpush.bf16.msra.mxu1 %v2126_v50 }
 0x26b   :  { %v641_v49 = vsub.f32 %v2250_v4, %v639_v33  ;;  %v642_v50 = vsub.f32 %v2252_v60, %v640_v39 }
 0x26d   :  { %1077 = vmatpush.bf16.msrb.mxu2 %v2129_v55  ;;  %1090 = vmatpush.bf16.msrb.mxu3 %v2135_v62  ;;  %v643_v55 = vpack.c.bf16 %v641_v49, %v641_v49  ;;  %v644_v62 = vpack.c.bf16 %v642_v50, %v642_v50 }
 0x26e   :  { %1103 = vmatpush.bf16.msra.mxu0 %v2139_v3  ;;  %1116 = vmatpush.bf16.msra.mxu1 %v2146_v8 }
 0x271   :  { %1078 = vmatpush.bf16.msrb.mxu2 %v2153_v46  ;;  %1091 = vmatpush.bf16.msrb.mxu3 %v2155_v13 }
 0x272   :  { %1104 = vmatpush.bf16.msra.mxu0 %v2161_v20  ;;  %1117 = vmatpush.bf16.msra.mxu1 %v2164_v26 }
 0x275   :  { %1079 = vmatpush.bf16.msrb.mxu2 %v2167_v15  ;;  %1092 = vmatpush.bf16.msrb.mxu3 %v2171_v40 }
 0x276   :  { %1105 = vmatpush.bf16.msra.mxu0 %v2175_v52  ;;  %1118 = vmatpush.bf16.msra.mxu1 %v2177_v56 }
 0x277   :  { %1032 = vmatmul.bf16.vlgmr.msra.gmra.mxu2 %v648_v16  ;;  %1045 = vmatmul.bf16.vlgmr.msra.gmra.mxu3 %v649_v45 }
 0x278   :  { %1058 = vmatmul.bf16.vlgmr.msrb.gmra.mxu0 %v648_v16  ;;  %1071 = vmatmul.bf16.vlgmr.msrb.gmra.mxu1 %v649_v45 }
 0x279   :  { %1080 = vmatpush.bf16.msrb.mxu2 %v2192_v54  ;;  %1093 = vmatpush.bf16.msrb.mxu3 %v2196_v44 }
 0x27a   :  { %1106 = vmatpush.bf16.msra.mxu0 %v2203_v11  ;;  %1119 = vmatpush.bf16.msra.mxu1 %v2205_v12 }
 0x27d   :  { %1081 = vmatpush.bf16.msrb.mxu2 %v2211_v25  ;;  %1094 = vmatpush.bf16.msrb.mxu3 %v2214_v30 }
 0x27e   :  { %1107 = vmatpush.bf16.msra.mxu0 %v2218_v48  ;;  %1120 = vmatpush.bf16.msra.mxu1 %v2220_v53 }
 0x281   :  { %1082 = vmatpush.bf16.msrb.mxu2 %v2223_v51  ;;  %1095 = vmatpush.bf16.msrb.mxu3 %v2226_v58  ;;  %v1654_v51 = vld [vmem:[%s2318_s7 + $0x2] sm:$0x3] }
 0x282   :  { %1108 = vmatpush.bf16.msra.mxu0 %v2230_v61  ;;  %1121 = vmatpush.bf16.msra.mxu1 %v2232_v63  ;;  %v1134_v2 = vperm.slane %v1654_v51, 1  ;;  %v1133_v21 = vperm.slane %v1654_v51, 0 }
 0x285   :  { %1083 = vmatpush.bf16.msrb.mxu2 %v2235_v37  ;;  %1096 = vmatpush.bf16.msrb.mxu3 %v2238_v43 }
 0x286   :  { %1109 = vmatpush.bf16.msra.mxu0 %v2242_v59  ;;  %1122 = vmatpush.bf16.msra.mxu1 %v2244_v14 }
 0x288   :  { %1084 = vmatmul.bf16.vlgmr.msrb.gmra.mxu2 %v643_v55  ;;  %1097 = vmatmul.bf16.vlgmr.msrb.gmra.mxu3 %v644_v62 }
 0x289   :  { %1110 = vmatmul.bf16.vlgmr.msra.gmra.mxu0 %v643_v55  ;;  %1123 = vmatmul.bf16.vlgmr.msra.gmra.mxu1 %v644_v62  ;;  %v1655_v55 = vld [vmem:[%s2319_s8 + $0x2] sm:$0x3] }
 0x2e5   :  { %v847_v3 = vpop.f32.mrf.mxu0  ;;  %v860_v8 = vpop.f32.mrf.mxu1 }
 0x2e6   :  { %v861_v25 = vadd.f32 %v860_v8, %v847_v3  ;;  %v1656_v3 = vld [vmem:[%s2320_s9 + $0x2] sm:$0x3] }
 0x2ea   :  { %v821_v46 = vpop.f32.mrf.mxu2  ;;  %v834_v13 = vpop.f32.mrf.mxu3 }
 0x2eb   :  { %v835_v58 = vadd.f32 %v834_v13, %v821_v46  ;;  %v1188_v13 = vperm.slane %v1655_v55, 0 }
 0x2ed   :  { %v849_v20 = vpop.f32.mrf.mxu0  ;;  %v862_v26 = vpop.f32.mrf.mxu1 }
 0x2f2   :  { %v823_v15 = vpop.f32.mrf.mxu2  ;;  %v836_v40 = vpop.f32.mrf.mxu3 }
 0x2f3   :  { %v1197_v15 = vperm.slane %v1656_v3, 0 }
 0x2f5   :  { %v1059_v52 = vpop.f32.mrf.mxu0  ;;  %v1072_v56 = vpop.f32.mrf.mxu1 }
 0x2f6   :  { %v1060_v53 = vadd.f32 %v1059_v52, %v861_v25  ;;  %v1189_v25 = vperm.slane %v1655_v55, 1 }
 0x2f8   :  { %v1073_v37 = vadd.f32 %v1072_v56, %v1060_v53  ;;  %v1198_v53 = vperm.slane %v1656_v3, 1 }
 0x2fa   :  { %v1033_v54 = vpop.f32.mrf.mxu2  ;;  %v1046_v44 = vpop.f32.mrf.mxu3 }
 0x2fb   :  { %v1034_v9 = vadd.f32 %v1033_v54, %v835_v58 }
 0x2fd   :  { %v1061_v11 = vpop.f32.mrf.mxu0  ;;  %v1074_v12 = vpop.f32.mrf.mxu1  ;;  %v1047_v18 = vadd.f32 %v1046_v44, %v1034_v9 }
 0x302   :  { %v1035_v30 = vpop.f32.mrf.mxu2  ;;  %v1048_v48 = vpop.f32.mrf.mxu3 }
 0x306   :  { %v1111_v61 = vpop.f32.mrf.mxu0  ;;  %v1124_v63 = vpop.f32.mrf.mxu1 }
 0x307   :  { %v1125_v43 = vadd.f32 %v1124_v63, %v1111_v61 }
 0x309   :  { %v1129_v10 = vadd.f32 %v1125_v43, %v1073_v37 }
 0x30b   :  { %v1085_v59 = vpop.f32.mrf.mxu2  ;;  %v1098_v14 = vpop.f32.mrf.mxu3  ;;  %v1138_v17 = vadd.f32 %v1134_v2, %v1129_v10 }
 0x30c   :  { %v1099_v19 = vadd.f32 %v1098_v14, %v1085_v59 }
 0x30d   :  { %1141 = vadd.xlane.f32.xlu2 %v1138_v17 }
 0x30e   :  { %v1128_v23 = vadd.f32 %v1099_v19, %v1047_v18  ;;  %v1113_v24 = vpop.f32.mrf.mxu0  ;;  %v1126_v1 = vpop.f32.mrf.mxu1 }
 0x30f   :  { %v1243_v1 = vld [vmem:[%s2321_s10] sm:$0x3] }
 0x310   :  { %v1137_v29 = vadd.f32 %v1133_v21, %v1128_v23 }
 0x312   :  { %1139 = vadd.xlane.f32.xlu0 %v1137_v29 }
 0x313   :  { %v1087_v31 = vpop.f32.mrf.mxu2  ;;  %v1100_v27 = vpop.f32.mrf.mxu3 }
 0x380   :  { %v1142_v34 = vpop.xlane.xlu2 %1141 }
 0x381   :  { %v1146_v38 = vmul.f32 0.01, %v1142_v34 }
 0x383   :  { %v1148_v47 = vsub.f32 %v1138_v17, %v1146_v38 }
 0x385   :  { %v1140_v36 = vpop.xlane.xlu0 %1139  ;;  %v1150_v57 = vsel %vm2085_vm1, %v1148_v47, 0.0 }
 0x386   :  { %v1145_v35 = vmul.f32 0.01, %v1140_v36  ;;  %v1154_v0 = vmul.f32 %v1150_v57, %v1150_v57 }
 0x388   :  { %v1147_v32 = vsub.f32 %v1137_v29, %v1145_v35  ;;  %v1245_v35 = vperm.slane %v1243_v1, 0 }
 0x38a   :  { %v1149_v41 = vsel %vm126_vm0, %v1147_v32, 0.0  ;;  %v1246_v32 = vperm.slane %v1243_v1, 1 }
 0x38b   :  { %v1151_v42 = vmul.f32 %v1149_v41, %v1149_v41 }
 0x38d   :  { %1152 = vadd.xlane.f32.xlu2 %v1151_v42 }
 0x395   :  { %1155 = vadd.xlane.f32.xlu2 %v1154_v0 }
 0x400   :  { %v1153_v5 = vpop.xlane.xlu2 %1152 }
 0x401   :  { %v1159_v6 = vmul.f32 0.01, %v1153_v5 }
 0x403   :  { %v1161_v7 = vadd.f32 1e-05, %v1159_v6 }
 0x405   :  { %1782 = vrsqrt.f32 %v1161_v7  ;;  %vm1169_vm1 = vweird.f32 %v1161_v7 }
 0x408   :  { %v1156_v16 = vpop.xlane.xlu2 %1155 }
 0x409   :  { %v1160_v45 = vmul.f32 0.01, %v1156_v16 }
 0x40b   :  { %v1783_v33 = vpop.eup %1782  ;;  %v1162_v39 = vadd.f32 1e-05, %v1160_v45 }
 0x40c   :  { %v1164_v49 = vmul.f32 %v1783_v33, %v1161_v7  ;;  %vm1170_vm0 = vweird.f32 %v1783_v33  ;;  %v1769_v7 = vld [vmem:[#allocation2] ss:$0 sm:$0xff] }
 0x40d   :  { %1784 = vrsqrt.f32 %v1162_v39  ;;  %vm1171_vm2 = vmor %vm1169_vm1, %vm1170_vm0  ;;  %vm1179_vm4 = vweird.f32 %v1162_v39 }
 0x40e   :  { %v1165_v22 = vmul.f32 %v1783_v33, %v1164_v49 }
 0x410   :  { %v1166_v50 = vmul.f32 0.5, %v1165_v22 }
 0x412   :  { %v1167_v28 = vsub.f32 1.5, %v1166_v50 }
 0x413   :  { %v1785_v62 = vpop.eup %1784 }
 0x414   :  { %v1168_v8 = vmul.f32 %v1783_v33, %v1167_v28  ;;  %v1174_v46 = vmul.f32 %v1785_v62, %v1162_v39  ;;  %vm1180_vm3 = vweird.f32 %v1785_v62 }
 0x415   :  { %vm1181_vm5 = vmor %vm1179_vm4, %vm1180_vm3 }
 0x416   :  { %v1172_v20 = vsel %vm1171_vm2, %v1783_v33, %v1168_v8  ;;  %v1175_v26 = vmul.f32 %v1785_v62, %v1174_v46 }
 0x417   :  { %v1183_v40 = vmul.f32 %v1172_v20, %v1149_v41 }
 0x418   :  { %v1176_v52 = vmul.f32 0.5, %v1175_v26 }
 0x419   :  { %v1192_v56 = vmul.f32 %v1188_v13, %v1183_v40 }
 0x41a   :  { %v1177_v54 = vsub.f32 1.5, %v1176_v52 }
 0x41b   :  { %v1201_v44 = vadd.f32 %v1197_v15, %v1192_v56 }
 0x41c   :  { %v1178_v11 = vmul.f32 %v1785_v62, %v1177_v54 }
 0x41d   :  { %v1203_v12 = vadd.f32 %v1201_v44, %v2250_v4 }
 0x41e   :  { %v1182_v30 = vsel %vm1181_vm5, %v1785_v62, %v1178_v11 }
 0x41f   :  { %v1657_v48 = vmul.f32 -1.442695, %v1203_v12  ;;  %v1184_v51 = vmul.f32 %v1182_v30, %v1150_v57 }
 0x421   :  { %1786 = vpow2.f32 %v1657_v48  ;;  %v1193_v58 = vmul.f32 %v1189_v25, %v1184_v51 }
 0x423   :  { %v1202_v61 = vadd.f32 %v1198_v53, %v1193_v58 }
 0x425   :  { %v1204_v63 = vadd.f32 %v1202_v61, %v2252_v60 }
 0x427   :  { %v1787_v37 = vpop.eup %1786  ;;  %v1658_v43 = vmul.f32 -1.442695, %v1204_v63 }
 0x428   :  { %v1211_v2 = vadd.f32 1.0, %v1787_v37 }
 0x429   :  { %1788 = vpow2.f32 %v1658_v43 }
 0x42a   :  { %1790 = vrcp.f32 %v1211_v2  ;;  %v1224_v23 = vand.u32 2147483648, %v1211_v2  ;;  %vm1218_vm7 = vweird.f32 %v1211_v2  ;;  %v1222_v24 = vand.u32 2147483647, %v1211_v2 }
 0x42c   :  { %v1225_v36 = vor.u32 1.1754944e-38, %v1224_v23  ;;  %vm1223_vm10 = vcmp.eq.f32.partialorder %v1222_v24, 8.507059e+37 }
 0x42f   :  { %v1789_v9 = vpop.eup %1788 }
 0x430   :  { %v1791_v10 = vpop.eup %1790  ;;  %v1212_v59 = vadd.f32 1.0, %v1789_v9 }
 0x431   :  { %v1214_v4 = vmul.f32 %v1791_v10, %v1211_v2  ;;  %vm1219_vm6 = vweird.f32 %v1791_v10 }
 0x432   :  { %1792 = vrcp.f32 %v1212_v59  ;;  %vm1220_vm8 = vmor %vm1218_vm7, %vm1219_vm6  ;;  %v1239_v29 = vand.u32 2147483648, %v1212_v59  ;;  %v1237_v34 = vand.u32 2147483647, %v1212_v59  ;;  %vm1233_vm11 = vweird.f32 %v1212_v59 }
 0x433   :  { %v1215_v14 = vsub.f32 1.0, %v1214_v4 }
 0x434   :  { %v1240_v42 = vor.u32 1.1754944e-38, %v1239_v29  ;;  %vm1238_vm13 = vcmp.eq.f32.partialorder %v1237_v34, 8.507059e+37 }
 0x435   :  { %v1216_v17 = vmul.f32 %v1791_v10, %v1215_v14 }
 0x437   :  { %v1217_v19 = vadd.f32 %v1791_v10, %v1216_v17 }
 0x438   :  { %v1793_v18 = vpop.eup %1792 }
 0x439   :  { %v1229_v21 = vmul.f32 %v1793_v18, %v1212_v59  ;;  %v1221_v31 = vsel %vm1220_vm8, %v1791_v10, %v1217_v19  ;;  %vm1234_vm9 = vweird.f32 %v1793_v18 }
 0x43a   :  { %v1226_v41 = vsel %vm1223_vm10, %v1225_v36, %v1221_v31  ;;  %vm1235_vm12 = vmor %vm1233_vm11, %vm1234_vm9 }
 0x43b   :  { %v1230_v60 = vsub.f32 1.0, %v1229_v21  ;;  %v1249_v0 = vmul.f32 %v1245_v35, %v1226_v41 }
 0x43d   :  { %v1231_v27 = vmul.f32 %v1793_v18, %v1230_v60 }
 0x43f   :  { %v1232_v38 = vadd.f32 %v1793_v18, %v1231_v27 }
 0x441   :  { %v1236_v47 = vsel %vm1235_vm12, %v1793_v18, %v1232_v38 }
 0x442   :  { %v1241_v57 = vsel %vm1238_vm13, %v1240_v42, %v1236_v47 }
 0x443   :  { %v1250_v5 = vmul.f32 %v1246_v32, %v1241_v57 }
 0x445   :  { %v1251_v6 = vadd.f32 %v1250_v5, %v1249_v0 }
 0x447   :  { %1252 = vadd.xlane.f32.xlu2 %v1251_v6 }
 0x4ba   :  { %v1253_v16 = vpop.xlane.xlu2 %1252 }
 0x4bb   :  { %v1258_v45 = vadd.f32 %v1769_v7, %v1253_v16 }
 0x4bd   :  { %1260 = vst.msk [vmem:[%s2323_s12] sm:$0xff] %vm1259_vm14, %v1258_v45 }
 0x4be   :  { %1265 = vsyncpa [#allocation4], 1 }
 0x4bf   :  { %1266 = vsyncpa [#allocation6], 1 }
 0x4c0   :  { %1267 = vsyncpa [#allocation9], 1 }

</bundles_post_ra>
